<compile_context>
chip_gen: v5e
topology: v5e:2x2
jax: 0.10.0
libtpu: 0.0.40
codegen_flags: <defaults>
</compile_context>

<pallas_src>
import jax
import jax.numpy as jnp
from jax import lax
from jax.experimental import pallas as pl
from jax.experimental.pallas import tpu as pltpu

# Static hyper-parameters (kept out of the jitted params pytree).
KERNEL_SIZE = 5
PADDING = 2
STRIDE = 1
SEQ_TILE = 16     # sequences per conv grid step -> matmul M = SEQ_TILE * lp >= 256 rows
BATCH_TILE = 8    # batch rows per score-stage grid step
LANE = 128
NEG_BIG = -1e30   # finite "-inf" for masked max / padded softmax lanes


def round_up(x, m):
    return (x + m - 1) // m * m


# ----------------------------------------------------------------------------
# Kernel 1: Conv1d (stride 1) + folded BatchNorm1d (eval) + max over positions.
# One kernel serves all three ConvNets; grid axis 0 selects the conv type.
# ----------------------------------------------------------------------------
def conv_bn_max_kernel(x_ref, w_ref, shift_ref, olen_ref, out_ref):
    """x_ref     : (seq_tile * lp, Cin) bf16 - lp-padded sequences flattened on rows
       w_ref     : (1, K, Cin, Cout)    bf16 - BN-scale-folded weight for this conv type
       shift_ref : (1, 1, Cout)         f32  - conv bias + BN shift (added after the max)
       olen_ref  : (seq_tile, 1)        int32 - valid conv positions per sequence
       out_ref   : (seq_tile, Cout)     f32
    """
    tr = x_ref.shape[0]
    seq_tile, cout = out_ref.shape
    ksize = w_ref.shape[1]
    lp = tr // seq_tile

    x = x_ref[...]                                    # bf16 straight into the MXU
    # Tail rows only feed positions the mask below discards (never cross sequences).
    x_ext = jnp.pad(x, ((0, ksize - 1), (0, 0)))

    # K accumulating matmuls (bf16 x bf16 -> f32 accumulate); no lane-axis im2col.
    acc = jnp.dot(x, w_ref[0, 0], preferred_element_type=jnp.float32)
    for k in range(1, ksize):
        acc = acc + jnp.dot(x_ext[k:k + tr, :], w_ref[0, k],
                            preferred_element_type=jnp.float32)

    # Per-sequence masked max: lp is a multiple of 8 so this reshape is tile-aligned.
    acc3 = acc.reshape(seq_tile, lp, cout)
    pos = lax.broadcasted_iota(jnp.int32, (seq_tile, lp, 1), 1)
    olen = olen_ref[...].reshape(seq_tile, 1, 1)
    masked = jnp.where(pos < olen, acc3, jnp.float32(NEG_BIG))
    out = jnp.max(masked, axis=1) + shift_ref[0]
    out_ref[...] = out


def conv_bn_max_fused(x_all, olen_all, w_stack, shift_stack, *, seq_tile, lp):
    """x_all: (3*n_pad*lp, Cin) bf16; olen_all: (3*n_pad, 1) i32;
       w_stack: (3, K, Cin, Cout) bf16; shift_stack: (3, 1, Cout) f32.
       Returns (3*n_pad, Cout) f32."""
    cin = x_all.shape[1]
    n_types, ksize, _, cout = w_stack.shape
    n_pad = olen_all.shape[0] // n_types
    assert n_pad % seq_tile == 0 and lp % 8 == 0
    n_steps = n_pad // seq_tile
    tr = seq_tile * lp

    # Lane-dense output stores: pad Cout to a multiple of 128 (zero weight columns).
    cout_p = round_up(cout, LANE)
    if cout_p != cout:
        w_stack = jnp.pad(w_stack, ((0, 0), (0, 0), (0, 0), (0, cout_p - cout)))
        shift_stack = jnp.pad(shift_stack, ((0, 0), (0, 0), (0, cout_p - cout)))

    out = pl.pallas_call(
        conv_bn_max_kernel,
        out_shape=jax.ShapeDtypeStruct((n_types * n_pad, cout_p), jnp.float32),
        grid=(n_types, n_steps),
        in_specs=[
            pl.BlockSpec((tr, cin), lambda c, i: (c * n_steps + i, 0)),
            pl.BlockSpec((1, ksize, cin, cout_p), lambda c, i: (c, 0, 0, 0)),
            pl.BlockSpec((1, 1, cout_p), lambda c, i: (c, 0, 0)),
            pl.BlockSpec((seq_tile, 1), lambda c, i: (c * n_steps + i, 0)),
        ],
        out_specs=pl.BlockSpec((seq_tile, cout_p), lambda c, i: (c * n_steps + i, 0)),
        compiler_params=pltpu.CompilerParams(
            dimension_semantics=("parallel", "parallel"),
            vmem_limit_bytes=32 * 1024 * 1024),
    )(x_all, w_stack, shift_stack, olen_all)
    return out[:, :cout]


# ----------------------------------------------------------------------------
# Kernel 2: projectors + bilinear scores + classifier + mask + softmax
# Batch-tiled grid; projector weights constant-indexed (stay resident).
# ----------------------------------------------------------------------------
def score_kernel(t_ref, ty_ref, q_ref, p_ref, r_ref, y_ref, an_ref,
                 wpT_ref, bp_ref, wqT_ref, bq_ref, clsw_ref, clsb_ref,
                 logits_ref, probs_ref):
    f32 = jnp.float32
    t_proj = jnp.dot(t_ref[...], wpT_ref[...], preferred_element_type=f32) + bp_ref[...]
    ty_proj = jnp.dot(ty_ref[...], wpT_ref[...], preferred_element_type=f32) + bp_ref[...]
    q_proj = jnp.dot(q_ref[...], wqT_ref[...], preferred_element_type=f32) + bq_ref[...]

    # Bilinear scores via broadcast-multiply + lane reduce (VPU/XLU; no M=1 MXU pushes).
    p_s = jnp.sum(p_ref[...] * t_proj[:, None, :], axis=-1)     # (TB, CN)
    r_s = jnp.sum(r_ref[...] * q_proj[:, None, :], axis=-1)
    y_s = jnp.sum(y_ref[...] * ty_proj[:, None, :], axis=-1)

    an = an_ref[...]
    # classifier: Linear(4,1) over cat((y_score, r_score, p_score, an))
    logits = (clsw_ref[0] * y_s + clsw_ref[1] * r_s + clsw_ref[2] * p_s
              + clsw_ref[3] * an + clsb_ref[0])

    tb, cn = an.shape
    cnp = logits_ref.shape[1]
    lane_pad = ((0, 0), (0, cnp - cn))
    logits_pad = jnp.pad(logits, lane_pad)
    an_pad = jnp.pad(an, lane_pad)
    col = lax.broadcasted_iota(jnp.int32, (tb, cnp), 1)
    masked = jnp.where(col < cn,
                       jnp.where(an_pad == 0.0, f32(-1e10), logits_pad),
                       f32(NEG_BIG))
    m = jnp.max(masked, axis=-1, keepdims=True)
    e = jnp.exp(masked - m)
    denom = jnp.sum(e, axis=-1, keepdims=True)
    probs = e * pl.reciprocal(denom, approx=True)

    logits_ref[...] = logits_pad
    probs_ref[...] = probs


def ranker_scores(t_rep, ty_rep, q_rep, p3, r3, y3, an,
                  wpT, bp, wqT, bq, cls_w, cls_b, *, batch_tile=BATCH_TILE):
    B, CN, H = p3.shape
    CNP = round_up(CN, LANE)                 # lane-dense score outputs
    B_pad = round_up(B, batch_tile)

    def pad_batch(x):
        pads = [(0, B_pad - B)] + [(0, 0)] * (x.ndim - 1)
        return jnp.pad(x, pads)

    t_rep, ty_rep, q_rep, p3, r3, y3, an = map(
        pad_batch, (t_rep, ty_rep, q_rep, p3, r3, y3, an))

    nb = B_pad // batch_tile
    rep_spec = pl.BlockSpec((batch_tile, H), lambda i: (i, 0))
    cand_spec = pl.BlockSpec((batch_tile, CN, H), lambda i: (i, 0, 0))
    out_spec = pl.BlockSpec((batch_tile, CNP), lambda i: (i, 0))
    smem = pl.BlockSpec(memory_space=pltpu.MemorySpace.SMEM)

    logits, probs = pl.pallas_call(
        score_kernel,
        out_shape=(jax.ShapeDtypeStruct((B_pad, CNP), jnp.float32),
                   jax.ShapeDtypeStruct((B_pad, CNP), jnp.float32)),
        grid=(nb,),
        in_specs=[
            rep_spec, rep_spec, rep_spec,
            cand_spec, cand_spec, cand_spec,
            pl.BlockSpec((batch_tile, CN), lambda i: (i, 0)),
            pl.BlockSpec((H, H), lambda i: (0, 0)),
            pl.BlockSpec((1, H), lambda i: (0, 0)),
            pl.BlockSpec((H, H), lambda i: (0, 0)),
            pl.BlockSpec((1, H), lambda i: (0, 0)),
            smem, smem,
        ],
        out_specs=(out_spec, out_spec),
        compiler_params=pltpu.CompilerParams(
            dimension_semantics=("parallel",),
            vmem_limit_bytes=32 * 1024 * 1024),
    )(t_rep, ty_rep, q_rep, p3, r3, y3, an, wpT, bp, wqT, bq, cls_w, cls_b)
    return logits[:B, :CN], probs[:B, :CN]


# ----------------------------------------------------------------------------
# Parameter init (deterministic, synthetic) + full forward
# ----------------------------------------------------------------------------
def make_conv_params(keys, cin, cout):
    k1, k2, k3, k4 = keys
    wc = 0.1 * jax.random.normal(k1, (cout, cin, KERNEL_SIZE), jnp.float32)  # torch layout
    bias = 0.1 * jax.random.normal(k2, (cout,), jnp.float32)
    gamma = 1.0 + 0.1 * jax.random.normal(k3, (cout,), jnp.float32)
    beta = 0.1 * jax.random.normal(k4, (cout,), jnp.float32)
    running_mean = jnp.zeros((cout,), jnp.float32)
    running_var = jnp.ones((cout,), jnp.float32)
    scale = gamma / jnp.sqrt(running_var + 1e-5)
    w_folded = wc * scale[:, None, None]                # fold BN scale into the weight
    w_kio = jnp.transpose(w_folded, (2, 1, 0))          # (K, Cin, Cout)
    shift = (bias - running_mean) * scale + beta        # applied after the max (commutes)
    return w_kio.astype(jnp.bfloat16), shift.reshape(1, cout)


def init_params(key, vocab, n_e, n_h):
    keys = jax.random.split(key, 19)
    convs = [make_conv_params(keys[1 + 4 * j:5 + 4 * j], n_e, n_h) for j in range(3)]
    return {
        "emb": (0.1 * jax.random.normal(keys[0], (vocab, n_e), jnp.float32)
                ).astype(jnp.bfloat16),
        # stacked [pattern, question, type] folded conv weights / shifts
        "conv_w": jnp.stack([w for w, _ in convs]),        # (3, K, Cin, Cout) bf16
        "conv_shift": jnp.stack([s for _, s in convs]),    # (3, 1, Cout) f32
        # nn.Linear weight is (out, in); store transposed so kernels do x @ W^T
        "wpT": jnp.transpose(0.1 * jax.random.normal(keys[13], (n_h, n_h), jnp.float32)),
        "bp": 0.1 * jax.random.normal(keys[14], (1, n_h), jnp.float32),
        "wqT": jnp.transpose(0.1 * jax.random.normal(keys[15], (n_h, n_h), jnp.float32)),
        "bq": 0.1 * jax.random.normal(keys[16], (1, n_h), jnp.float32),
        "cls_w": 0.1 * jax.random.normal(keys[17], (4,), jnp.float32),
        "cls_b": 0.1 * jax.random.normal(keys[18], (1,), jnp.float32),
    }


def ranker_forward(params, t, q, p, r, y, an, anlen,
                   *, seq_tile=SEQ_TILE, batch_tile=BATCH_TILE):
    B, tl = t.shape
    _, CN, p_len = p.shape
    ql = q.shape[1]
    rl = r.shape[2]
    yl = y.shape[2]
    emb = params["emb"]
    n_e = emb.shape[1]
    n_h = params["wpT"].shape[0]

    def embed(ids):  # (..., L) int32 -> (rows, L, n_e) channels-last bf16
        return jnp.take(emb, ids.reshape(-1, ids.shape[-1]), axis=0)

    t_emb, q_emb = embed(t), embed(q)
    p_emb, r_emb, y_emb = embed(p), embed(r), embed(y)

    # Common padded length (multiple of 8) shared by all conv types / sequences.
    max_len = max(tl, ql, p_len, rl, yl)
    lp = round_up(max_len + 2 * PADDING, 8)
    n_per_type = B + B * CN
    n_pad = round_up(n_per_type, seq_tile)

    # TODO(synk): gather embeddings + build the conv halo in-kernel (scalar-prefetched
    # token ids, manual DMA from the bf16 table) to avoid this wrapper HBM round trip.
    def pad_seq(x):
        n, L, _ = x.shape
        return jnp.pad(x, ((0, 0), (PADDING, lp - PADDING - L), (0, 0)))

    def build_type(xa, la, xb, lb):
        rows = jnp.concatenate([pad_seq(xa), pad_seq(xb)], axis=0)
        rows = jnp.pad(rows, ((0, n_pad - n_per_type), (0, 0), (0, 0)))
        out_len = lambda L: L + 2 * PADDING - KERNEL_SIZE + 1
        olen = jnp.concatenate([
            jnp.full((xa.shape[0],), out_len(la), jnp.int32),
            jnp.full((xb.shape[0],), out_len(lb), jnp.int32),
            jnp.ones((n_pad - n_per_type,), jnp.int32)])
        return rows, olen

    rows_p, olen_p = build_type(t_emb, tl, p_emb, p_len)   # pattern_cnn : [t; p]
    rows_q, olen_q = build_type(q_emb, ql, r_emb, rl)      # question_cnn: [q; r]
    rows_t, olen_t = build_type(t_emb, tl, y_emb, yl)      # type_cnn    : [t; y]

    x_all = jnp.concatenate([rows_p, rows_q, rows_t],
                            axis=0).reshape(3 * n_pad * lp, n_e)
    olen_all = jnp.concatenate([olen_p, olen_q, olen_t], axis=0).reshape(3 * n_pad, 1)

    reps = conv_bn_max_fused(x_all, olen_all, params["conv_w"], params["conv_shift"],
                             seq_tile=seq_tile, lp=lp)      # (3*n_pad, n_h) f32

    t_rep = reps[0:B]
    p_rep = reps[B:B + B * CN].reshape(B, CN, n_h)
    q_rep = reps[n_pad:n_pad + B]
    r_rep = reps[n_pad + B:n_pad + B + B * CN].reshape(B, CN, n_h)
    ty_rep = reps[2 * n_pad:2 * n_pad + B]
    y_rep = reps[2 * n_pad + B:2 * n_pad + B + B * CN].reshape(B, CN, n_h)

    # anlen is log-transformed in the reference but never reaches the classifier.
    del anlen

    return ranker_scores(t_rep, ty_rep, q_rep, p_rep, r_rep, y_rep,
                         an.astype(jnp.float32),
                         params["wpT"], params["bp"], params["wqT"], params["bq"],
                         params["cls_w"], params["cls_b"], batch_tile=batch_tile)


# ----------------------------------------------------------------------------
# Pure-JAX reference (same folded bf16 weights / bf16 embeddings) for checking
# ----------------------------------------------------------------------------
def reference_forward(params, t, q, p, r, y, an):
    B, CN, _ = p.shape
    H = params["wpT"].shape[0]
    emb = params["emb"].astype(jnp.float32)

    def embed(ids):
        return jnp.take(emb, ids.reshape(-1, ids.shape[-1]), axis=0)

    def conv_ref(ids, c):
        x = embed(ids)
        N, L, _ = x.shape
        w = params["conv_w"][c].astype(jnp.float32)          # (K, Cin, Cout)
        K = w.shape[0]
        xp = jnp.pad(x, ((0, 0), (PADDING, PADDING), (0, 0)))
        out_len = L + 2 * PADDING - K + 1
        acc = jnp.zeros((N, out_len, w.shape[2]), jnp.float32)
        for k in range(K):
            acc = acc + jnp.einsum("nlc,co->nlo", xp[:, k:k + out_len, :], w[k],
                                   precision="highest")
        return jnp.max(acc, axis=1) + params["conv_shift"][c]

    t_rep = conv_ref(t, 0)
    p_rep = conv_ref(p, 0).reshape(B, CN, H)
    q_rep = conv_ref(q, 1)
    r_rep = conv_ref(r, 1).reshape(B, CN, H)
    ty_rep = conv_ref(t, 2)
    y_rep = conv_ref(y, 2).reshape(B, CN, H)

    t_proj = jnp.dot(t_rep, params["wpT"], precision="highest") + params["bp"]
    q_proj = jnp.dot(q_rep, params["wqT"], precision="highest") + params["bq"]
    ty_proj = jnp.dot(ty_rep, params["wpT"], precision="highest") + params["bp"]

    p_s = jnp.einsum("bch,bh->bc", p_rep, t_proj, precision="highest")
    r_s = jnp.einsum("bch,bh->bc", r_rep, q_proj, precision="highest")
    y_s = jnp.einsum("bch,bh->bc", y_rep, ty_proj, precision="highest")

    w4 = params["cls_w"]
    logits = w4[0] * y_s + w4[1] * r_s + w4[2] * p_s + w4[3] * an + params["cls_b"][0]
    masked = jnp.where(an == 0.0, -1e10, logits)
    probs = jax.nn.softmax(masked, axis=-1)
    return logits, probs


if __name__ == "__main__":
    vocab, n_e, n_h = 50, 32, 128
    B, CN = 2, 4
    tl = ql = p_len = rl = yl = 8

    params = init_params(jax.random.PRNGKey(0), vocab, n_e, n_h)

    ks = jax.random.split(jax.random.PRNGKey(0), 8)
    t = jax.random.randint(ks[1], (B, tl), 0, vocab, dtype=jnp.int32)
    q = jax.random.randint(ks[2], (B, ql), 0, vocab, dtype=jnp.int32)
    p = jax.random.randint(ks[3], (B, CN, p_len), 0, vocab, dtype=jnp.int32)
    r = jax.random.randint(ks[4], (B, CN, rl), 0, vocab, dtype=jnp.int32)
    y = jax.random.randint(ks[5], (B, CN, yl), 0, vocab, dtype=jnp.int32)
    # `an` contains zeros to exercise the padding mask
    an = jnp.array([[1.0, 2.0, 0.0, 3.0],
                    [4.0, 0.0, 5.0, 6.0]], dtype=jnp.float32)
    anlen = jnp.array([[3.0, 1.0, 0.0, 2.0],
                       [2.0, 0.0, 4.0, 1.0]], dtype=jnp.float32)

    logits, probs = jax.jit(ranker_forward)(params, t, q, p, r, y, an, anlen)
    jax.block_until_ready((logits, probs))

    ref_logits, ref_probs = jax.jit(reference_forward)(params, t, q, p, r, y, an)
    jax.block_until_ready((ref_logits, ref_probs))

    assert logits.shape == (B, CN) and probs.shape == (B, CN)
    assert bool(jnp.all(jnp.isfinite(logits))) and bool(jnp.all(jnp.isfinite(probs)))
    # softmax denominator uses pl.reciprocal(approx=True) -> slightly looser prob checks
    assert bool(jnp.allclose(jnp.sum(probs, axis=1), 1.0, atol=1e-2))
    assert bool(jnp.allclose(logits, ref_logits, atol=5e-3, rtol=5e-3))
    assert bool(jnp.allclose(probs, ref_probs, atol=1e-2, rtol=1e-2))
    print("KERNEL_OK")
</pallas_src>

<mosaic_0001>
module attributes {stable_mosaic.version = 11 : i64} {
  func.func @conv_bn_max_kernel(%arg0: i32, %arg1: i32, %arg2: memref<256x32xbf16, #tpu.memory_space<vmem>>, %arg3: memref<1x5x32x128xbf16, #tpu.memory_space<vmem>>, %arg4: memref<1x1x128xf32, #tpu.memory_space<vmem>>, %arg5: memref<16x1xi32, #tpu.memory_space<vmem>>, %arg6: memref<16x128xf32, #tpu.memory_space<vmem>>) attributes {dimension_semantics = [#tpu.dimension_semantics<parallel>, #tpu.dimension_semantics<parallel>], iteration_bounds = array<i64: 3, 1>, scalar_prefetch = 0 : i64, scratch_operands = 0 : i64, tpu.core_type = #tpu.core_type<tc>, window_params = [{transform_indices = @transform_0, window_bounds = array<i64: 256, 32>}, {transform_indices = @transform_1, window_bounds = array<i64: 1, 5, 32, 128>}, {transform_indices = @transform_2, window_bounds = array<i64: 1, 1, 128>}, {transform_indices = @transform_3, window_bounds = array<i64: 16, 1>}, {transform_indices = @transform_4, window_bounds = array<i64: 16, 128>}]} {
    %c0 = arith.constant 0 : index
    %c0_0 = arith.constant 0 : index
    %0 = vector.load %arg2[%c0, %c0_0] : memref<256x32xbf16, #tpu.memory_space<vmem>>, vector<256x32xbf16>
    %c0_i32 = arith.constant 0 : i32
    %1 = arith.sitofp %c0_i32 : i32 to bf16
    %2 = vector.broadcast %1 : bf16 to vector<4x32xbf16>
    %3 = tpu.concatenate %0, %2 in 0 : vector<256x32xbf16>, vector<4x32xbf16> -> vector<260x32xbf16>
    %c0_1 = arith.constant 0 : index
    %c0_2 = arith.constant 0 : index
    %c0_3 = arith.constant 0 : index
    %c0_4 = arith.constant 0 : index
    %4 = vector.load %arg3[%c0_1, %c0_2, %c0_3, %c0_4] : memref<1x5x32x128xbf16, #tpu.memory_space<vmem>>, vector<1x1x32x128xbf16>
    %5 = vector.shape_cast %4 : vector<1x1x32x128xbf16> to vector<32x128xbf16>
    %cst = arith.constant dense<0.000000e+00> : vector<256x128xf32>
    %6 = tpu.matmul %0, %5, %cst {dimension_numbers = #tpu.dot_dimension_numbers<[1], [0], [0], [1], [0, 0, 1, 1], [], []>} : vector<256x32xbf16>, vector<32x128xbf16>, vector<256x128xf32> -> vector<256x128xf32>
    %7 = vector.extract_strided_slice %3 {offsets = [1, 0], sizes = [256, 32], strides = [1, 1]} : vector<260x32xbf16> to vector<256x32xbf16>
    %c0_5 = arith.constant 0 : index
    %c1 = arith.constant 1 : index
    %c0_6 = arith.constant 0 : index
    %c0_7 = arith.constant 0 : index
    %8 = vector.load %arg3[%c0_5, %c1, %c0_6, %c0_7] : memref<1x5x32x128xbf16, #tpu.memory_space<vmem>>, vector<1x1x32x128xbf16>
    %9 = vector.shape_cast %8 : vector<1x1x32x128xbf16> to vector<32x128xbf16>
    %cst_8 = arith.constant dense<0.000000e+00> : vector<256x128xf32>
    %10 = tpu.matmul %7, %9, %cst_8 {dimension_numbers = #tpu.dot_dimension_numbers<[1], [0], [0], [1], [0, 0, 1, 1], [], []>} : vector<256x32xbf16>, vector<32x128xbf16>, vector<256x128xf32> -> vector<256x128xf32>
    %11 = arith.addf %6, %10 : vector<256x128xf32>
    %12 = vector.extract_strided_slice %3 {offsets = [2, 0], sizes = [256, 32], strides = [1, 1]} : vector<260x32xbf16> to vector<256x32xbf16>
    %c0_9 = arith.constant 0 : index
    %c2 = arith.constant 2 : index
    %c0_10 = arith.constant 0 : index
    %c0_11 = arith.constant 0 : index
    %13 = vector.load %arg3[%c0_9, %c2, %c0_10, %c0_11] : memref<1x5x32x128xbf16, #tpu.memory_space<vmem>>, vector<1x1x32x128xbf16>
    %14 = vector.shape_cast %13 : vector<1x1x32x128xbf16> to vector<32x128xbf16>
    %cst_12 = arith.constant dense<0.000000e+00> : vector<256x128xf32>
    %15 = tpu.matmul %12, %14, %cst_12 {dimension_numbers = #tpu.dot_dimension_numbers<[1], [0], [0], [1], [0, 0, 1, 1], [], []>} : vector<256x32xbf16>, vector<32x128xbf16>, vector<256x128xf32> -> vector<256x128xf32>
    %16 = arith.addf %11, %15 : vector<256x128xf32>
    %17 = vector.extract_strided_slice %3 {offsets = [3, 0], sizes = [256, 32], strides = [1, 1]} : vector<260x32xbf16> to vector<256x32xbf16>
    %c0_13 = arith.constant 0 : index
    %c3 = arith.constant 3 : index
    %c0_14 = arith.constant 0 : index
    %c0_15 = arith.constant 0 : index
    %18 = vector.load %arg3[%c0_13, %c3, %c0_14, %c0_15] : memref<1x5x32x128xbf16, #tpu.memory_space<vmem>>, vector<1x1x32x128xbf16>
    %19 = vector.shape_cast %18 : vector<1x1x32x128xbf16> to vector<32x128xbf16>
    %cst_16 = arith.constant dense<0.000000e+00> : vector<256x128xf32>
    %20 = tpu.matmul %17, %19, %cst_16 {dimension_numbers = #tpu.dot_dimension_numbers<[1], [0], [0], [1], [0, 0, 1, 1], [], []>} : vector<256x32xbf16>, vector<32x128xbf16>, vector<256x128xf32> -> vector<256x128xf32>
    %21 = arith.addf %16, %20 : vector<256x128xf32>
    %22 = vector.extract_strided_slice %3 {offsets = [4, 0], sizes = [256, 32], strides = [1, 1]} : vector<260x32xbf16> to vector<256x32xbf16>
    %c0_17 = arith.constant 0 : index
    %c4 = arith.constant 4 : index
    %c0_18 = arith.constant 0 : index
    %c0_19 = arith.constant 0 : index
    %23 = vector.load %arg3[%c0_17, %c4, %c0_18, %c0_19] : memref<1x5x32x128xbf16, #tpu.memory_space<vmem>>, vector<1x1x32x128xbf16>
    %24 = vector.shape_cast %23 : vector<1x1x32x128xbf16> to vector<32x128xbf16>
    %cst_20 = arith.constant dense<0.000000e+00> : vector<256x128xf32>
    %25 = tpu.matmul %22, %24, %cst_20 {dimension_numbers = #tpu.dot_dimension_numbers<[1], [0], [0], [1], [0, 0, 1, 1], [], []>} : vector<256x32xbf16>, vector<32x128xbf16>, vector<256x128xf32> -> vector<256x128xf32>
    %26 = arith.addf %21, %25 : vector<256x128xf32>
    %27 = vector.shape_cast %26 : vector<256x128xf32> to vector<16x16x128xf32>
    %28 = tpu.iota {dimensions = array<i32: 1>} : vector<16x16x1xi32>
    %c0_21 = arith.constant 0 : index
    %c0_22 = arith.constant 0 : index
    %29 = vector.load %arg5[%c0_21, %c0_22] : memref<16x1xi32, #tpu.memory_space<vmem>>, vector<16x1xi32>
    %30 = vector.shape_cast %29 : vector<16x1xi32> to vector<16x1x1xi32>
    %31 = vector.broadcast %30 : vector<16x1x1xi32> to vector<16x16x1xi32>
    %32 = arith.cmpi slt, %28, %31 : vector<16x16x1xi32>
    %cst_23 = arith.constant -1.000000e+30 : f32
    %33 = vector.shape_cast %32 : vector<16x16x1xi1> to vector<16x16x1xi1>
    %34 = vector.broadcast %33 : vector<16x16x1xi1> to vector<16x16x128xi1>
    %35 = vector.broadcast %cst_23 : f32 to vector<16x16x128xf32>
    %36 = arith.select %34, %27, %35 : vector<16x16x128xi1>, vector<16x16x128xf32>
    %cst_24 = arith.constant dense<0xFF800000> : vector<16x128xf32>
    %37 = vector.multi_reduction <maximumf>, %36, %cst_24 [1] : vector<16x16x128xf32> to vector<16x128xf32>
    %c0_25 = arith.constant 0 : index
    %c0_26 = arith.constant 0 : index
    %c0_27 = arith.constant 0 : index
    %38 = vector.load %arg4[%c0_25, %c0_26, %c0_27] : memref<1x1x128xf32, #tpu.memory_space<vmem>>, vector<1x1x128xf32>
    %39 = vector.shape_cast %38 : vector<1x1x128xf32> to vector<1x128xf32>
    %40 = vector.broadcast %39 : vector<1x128xf32> to vector<16x128xf32>
    %41 = arith.addf %37, %40 : vector<16x128xf32>
    %c0_28 = arith.constant 0 : index
    %c0_29 = arith.constant 0 : index
    %42 = vector.load %arg6[%c0_28, %c0_29] : memref<16x128xf32, #tpu.memory_space<vmem>>, vector<16x128xf32>
    tpu.vector_store %arg6[%c0_28, %c0_29], %41 {strides = array<i32>} : memref<16x128xf32, #tpu.memory_space<vmem>>, vector<16x128xf32>,
    return
  }
  func.func @transform_0(%arg0: i32, %arg1: i32) -> (i32, i32) {
    %c1_i32 = arith.constant 1 : i32
    %0 = arith.muli %arg0, %c1_i32 : i32
    %1 = arith.addi %0, %arg1 : i32
    %c0_i32 = arith.constant 0 : i32
    %c0_i32_0 = arith.constant 0 : i32
    return %1, %c0_i32 : i32, i32
  }
  func.func @transform_1(%arg0: i32, %arg1: i32) -> (i32, i32, i32, i32) {
    %c0_i32 = arith.constant 0 : i32
    %c0_i32_0 = arith.constant 0 : i32
    %c0_i32_1 = arith.constant 0 : i32
    %c0_i32_2 = arith.constant 0 : i32
    return %arg0, %c0_i32, %c0_i32_0, %c0_i32_1 : i32, i32, i32, i32
  }
  func.func @transform_2(%arg0: i32, %arg1: i32) -> (i32, i32, i32) {
    %c0_i32 = arith.constant 0 : i32
    %c0_i32_0 = arith.constant 0 : i32
    %c0_i32_1 = arith.constant 0 : i32
    return %arg0, %c0_i32, %c0_i32_0 : i32, i32, i32
  }
  func.func @transform_3(%arg0: i32, %arg1: i32) -> (i32, i32) {
    %c1_i32 = arith.constant 1 : i32
    %0 = arith.muli %arg0, %c1_i32 : i32
    %1 = arith.addi %0, %arg1 : i32
    %c0_i32 = arith.constant 0 : i32
    %c0_i32_0 = arith.constant 0 : i32
    return %1, %c0_i32 : i32, i32
  }
  func.func @transform_4(%arg0: i32, %arg1: i32) -> (i32, i32) {
    %c1_i32 = arith.constant 1 : i32
    %0 = arith.muli %arg0, %c1_i32 : i32
    %1 = arith.addi %0, %arg1 : i32
    %c0_i32 = arith.constant 0 : i32
    %c0_i32_0 = arith.constant 0 : i32
    return %1, %c0_i32 : i32, i32
  }
}

module attributes {stable_mosaic.version = 11 : i64} {
  func.func @score_kernel(%arg0: i32, %arg1: memref<8x128xf32, #tpu.memory_space<vmem>>, %arg2: memref<8x128xf32, #tpu.memory_space<vmem>>, %arg3: memref<8x128xf32, #tpu.memory_space<vmem>>, %arg4: memref<8x4x128xf32, #tpu.memory_space<vmem>>, %arg5: memref<8x4x128xf32, #tpu.memory_space<vmem>>, %arg6: memref<8x4x128xf32, #tpu.memory_space<vmem>>, %arg7: memref<8x4xf32, #tpu.memory_space<vmem>>, %arg8: memref<128x128xf32, #tpu.memory_space<vmem>>, %arg9: memref<1x128xf32, #tpu.memory_space<vmem>>, %arg10: memref<128x128xf32, #tpu.memory_space<vmem>>, %arg11: memref<1x128xf32, #tpu.memory_space<vmem>>, %arg12: memref<4xf32, #tpu.memory_space<smem>>, %arg13: memref<1xf32, #tpu.memory_space<smem>>, %arg14: memref<8x128xf32, #tpu.memory_space<vmem>>, %arg15: memref<8x128xf32, #tpu.memory_space<vmem>>) attributes {dimension_semantics = [#tpu.dimension_semantics<parallel>], iteration_bounds = array<i64: 1>, scalar_prefetch = 0 : i64, scratch_operands = 0 : i64, tpu.core_type = #tpu.core_type<tc>, window_params = [{transform_indices = @transform_0, window_bounds = array<i64: 8, 128>}, {transform_indices = @transform_1, window_bounds = array<i64: 8, 128>}, {transform_indices = @transform_2, window_bounds = array<i64: 8, 128>}, {transform_indices = @transform_3, window_bounds = array<i64: 8, 4, 128>}, {transform_indices = @transform_4, window_bounds = array<i64: 8, 4, 128>}, {transform_indices = @transform_5, window_bounds = array<i64: 8, 4, 128>}, {transform_indices = @transform_6, window_bounds = array<i64: 8, 4>}, {pipeline_mode = #tpu.pipeline_mode<synchronous>, transform_indices = @transform_7, window_bounds = array<i64: 128, 128>}, {pipeline_mode = #tpu.pipeline_mode<synchronous>, transform_indices = @transform_8, window_bounds = array<i64: 1, 128>}, {pipeline_mode = #tpu.pipeline_mode<synchronous>, transform_indices = @transform_9, window_bounds = array<i64: 128, 128>}, {pipeline_mode = #tpu.pipeline_mode<synchronous>, transform_indices = @transform_10, window_bounds = array<i64: 1, 128>}, {transform_indices = @transform_11, window_bounds = array<i64: 4>}, {transform_indices = @transform_12, window_bounds = array<i64: 1>}, {transform_indices = @transform_13, window_bounds = array<i64: 8, 128>}, {transform_indices = @transform_14, window_bounds = array<i64: 8, 128>}]} {
    %c0 = arith.constant 0 : index
    %c0_0 = arith.constant 0 : index
    %0 = vector.load %arg1[%c0, %c0_0] : memref<8x128xf32, #tpu.memory_space<vmem>>, vector<8x128xf32>
    %c0_1 = arith.constant 0 : index
    %c0_2 = arith.constant 0 : index
    %1 = vector.load %arg8[%c0_1, %c0_2] : memref<128x128xf32, #tpu.memory_space<vmem>>, vector<128x128xf32>
    %cst = arith.constant dense<0.000000e+00> : vector<8x128xf32>
    %2 = tpu.matmul %0, %1, %cst {dimension_numbers = #tpu.dot_dimension_numbers<[1], [0], [0], [1], [0, 0, 1, 1], [], []>} : vector<8x128xf32>, vector<128x128xf32>, vector<8x128xf32> -> vector<8x128xf32>
    %c0_3 = arith.constant 0 : index
    %c0_4 = arith.constant 0 : index
    %3 = vector.load %arg9[%c0_3, %c0_4] : memref<1x128xf32, #tpu.memory_space<vmem>>, vector<1x128xf32>
    %4 = vector.broadcast %3 : vector<1x128xf32> to vector<8x128xf32>
    %5 = arith.addf %2, %4 : vector<8x128xf32>
    %c0_5 = arith.constant 0 : index
    %c0_6 = arith.constant 0 : index
    %6 = vector.load %arg2[%c0_5, %c0_6] : memref<8x128xf32, #tpu.memory_space<vmem>>, vector<8x128xf32>
    %c0_7 = arith.constant 0 : index
    %c0_8 = arith.constant 0 : index
    %7 = vector.load %arg8[%c0_7, %c0_8] : memref<128x128xf32, #tpu.memory_space<vmem>>, vector<128x128xf32>
    %cst_9 = arith.constant dense<0.000000e+00> : vector<8x128xf32>
    %8 = tpu.matmul %6, %7, %cst_9 {dimension_numbers = #tpu.dot_dimension_numbers<[1], [0], [0], [1], [0, 0, 1, 1], [], []>} : vector<8x128xf32>, vector<128x128xf32>, vector<8x128xf32> -> vector<8x128xf32>
    %c0_10 = arith.constant 0 : index
    %c0_11 = arith.constant 0 : index
    %9 = vector.load %arg9[%c0_10, %c0_11] : memref<1x128xf32, #tpu.memory_space<vmem>>, vector<1x128xf32>
    %10 = vector.broadcast %9 : vector<1x128xf32> to vector<8x128xf32>
    %11 = arith.addf %8, %10 : vector<8x128xf32>
    %c0_12 = arith.constant 0 : index
    %c0_13 = arith.constant 0 : index
    %12 = vector.load %arg3[%c0_12, %c0_13] : memref<8x128xf32, #tpu.memory_space<vmem>>, vector<8x128xf32>
    %c0_14 = arith.constant 0 : index
    %c0_15 = arith.constant 0 : index
    %13 = vector.load %arg10[%c0_14, %c0_15] : memref<128x128xf32, #tpu.memory_space<vmem>>, vector<128x128xf32>
    %cst_16 = arith.constant dense<0.000000e+00> : vector<8x128xf32>
    %14 = tpu.matmul %12, %13, %cst_16 {dimension_numbers = #tpu.dot_dimension_numbers<[1], [0], [0], [1], [0, 0, 1, 1], [], []>} : vector<8x128xf32>, vector<128x128xf32>, vector<8x128xf32> -> vector<8x128xf32>
    %c0_17 = arith.constant 0 : index
    %c0_18 = arith.constant 0 : index
    %15 = vector.load %arg11[%c0_17, %c0_18] : memref<1x128xf32, #tpu.memory_space<vmem>>, vector<1x128xf32>
    %16 = vector.broadcast %15 : vector<1x128xf32> to vector<8x128xf32>
    %17 = arith.addf %14, %16 : vector<8x128xf32>
    %c0_19 = arith.constant 0 : index
    %c0_20 = arith.constant 0 : index
    %c0_21 = arith.constant 0 : index
    %18 = vector.load %arg4[%c0_19, %c0_20, %c0_21] : memref<8x4x128xf32, #tpu.memory_space<vmem>>, vector<8x4x128xf32>
    %19 = vector.shape_cast %5 : vector<8x128xf32> to vector<8x1x128xf32>
    %20 = vector.broadcast %19 : vector<8x1x128xf32> to vector<8x4x128xf32>
    %21 = arith.mulf %18, %20 : vector<8x4x128xf32>
    %cst_22 = arith.constant dense<0.000000e+00> : vector<8x4xf32>
    %22 = vector.multi_reduction <add>, %21, %cst_22 [2] : vector<8x4x128xf32> to vector<8x4xf32>
    %c0_23 = arith.constant 0 : index
    %c0_24 = arith.constant 0 : index
    %c0_25 = arith.constant 0 : index
    %23 = vector.load %arg5[%c0_23, %c0_24, %c0_25] : memref<8x4x128xf32, #tpu.memory_space<vmem>>, vector<8x4x128xf32>
    %24 = vector.shape_cast %17 : vector<8x128xf32> to vector<8x1x128xf32>
    %25 = vector.broadcast %24 : vector<8x1x128xf32> to vector<8x4x128xf32>
    %26 = arith.mulf %23, %25 : vector<8x4x128xf32>
    %cst_26 = arith.constant dense<0.000000e+00> : vector<8x4xf32>
    %27 = vector.multi_reduction <add>, %26, %cst_26 [2] : vector<8x4x128xf32> to vector<8x4xf32>
    %c0_27 = arith.constant 0 : index
    %c0_28 = arith.constant 0 : index
    %c0_29 = arith.constant 0 : index
    %28 = vector.load %arg6[%c0_27, %c0_28, %c0_29] : memref<8x4x128xf32, #tpu.memory_space<vmem>>, vector<8x4x128xf32>
    %29 = vector.shape_cast %11 : vector<8x128xf32> to vector<8x1x128xf32>
    %30 = vector.broadcast %29 : vector<8x1x128xf32> to vector<8x4x128xf32>
    %31 = arith.mulf %28, %30 : vector<8x4x128xf32>
    %cst_30 = arith.constant dense<0.000000e+00> : vector<8x4xf32>
    %32 = vector.multi_reduction <add>, %31, %cst_30 [2] : vector<8x4x128xf32> to vector<8x4xf32>
    %c0_31 = arith.constant 0 : index
    %c0_32 = arith.constant 0 : index
    %33 = vector.load %arg7[%c0_31, %c0_32] : memref<8x4xf32, #tpu.memory_space<vmem>>, vector<8x4xf32>
    %c0_33 = arith.constant 0 : index
    %34 = memref.load %arg12[%c0_33] : memref<4xf32, #tpu.memory_space<smem>>
    %35 = vector.broadcast %34 : f32 to vector<8x4xf32>
    %36 = arith.mulf %35, %32 : vector<8x4xf32>
    %c1 = arith.constant 1 : index
    %37 = memref.load %arg12[%c1] : memref<4xf32, #tpu.memory_space<smem>>
    %38 = vector.broadcast %37 : f32 to vector<8x4xf32>
    %39 = arith.mulf %38, %27 : vector<8x4xf32>
    %40 = arith.addf %36, %39 : vector<8x4xf32>
    %c2 = arith.constant 2 : index
    %41 = memref.load %arg12[%c2] : memref<4xf32, #tpu.memory_space<smem>>
    %42 = vector.broadcast %41 : f32 to vector<8x4xf32>
    %43 = arith.mulf %42, %22 : vector<8x4xf32>
    %44 = arith.addf %40, %43 : vector<8x4xf32>
    %c3 = arith.constant 3 : index
    %45 = memref.load %arg12[%c3] : memref<4xf32, #tpu.memory_space<smem>>
    %46 = vector.broadcast %45 : f32 to vector<8x4xf32>
    %47 = arith.mulf %46, %33 : vector<8x4xf32>
    %48 = arith.addf %44, %47 : vector<8x4xf32>
    %c0_34 = arith.constant 0 : index
    %49 = memref.load %arg13[%c0_34] : memref<1xf32, #tpu.memory_space<smem>>
    %50 = vector.broadcast %49 : f32 to vector<8x4xf32>
    %51 = arith.addf %48, %50 : vector<8x4xf32>
    %c0_i32 = arith.constant 0 : i32
    %52 = arith.sitofp %c0_i32 : i32 to f32
    %53 = vector.broadcast %52 : f32 to vector<8x124xf32>
    %54 = tpu.concatenate %51, %53 in 1 : vector<8x4xf32>, vector<8x124xf32> -> vector<8x128xf32>
    %c0_i32_35 = arith.constant 0 : i32
    %55 = arith.sitofp %c0_i32_35 : i32 to f32
    %56 = vector.broadcast %55 : f32 to vector<8x124xf32>
    %57 = tpu.concatenate %33, %56 in 1 : vector<8x4xf32>, vector<8x124xf32> -> vector<8x128xf32>
    %58 = tpu.iota {dimensions = array<i32: 1>} : vector<8x128xi32>
    %c4_i32 = arith.constant 4 : i32
    %59 = vector.broadcast %c4_i32 : i32 to vector<8x128xi32>
    %60 = arith.cmpi slt, %58, %59 : vector<8x128xi32>
    %cst_36 = arith.constant 0.000000e+00 : f32
    %61 = vector.broadcast %cst_36 : f32 to vector<8x128xf32>
    %62 = arith.cmpf oeq, %57, %61 : vector<8x128xf32>
    %cst_37 = arith.constant -1.000000e+10 : f32
    %63 = vector.broadcast %cst_37 : f32 to vector<8x128xf32>
    %64 = arith.select %62, %63, %54 : vector<8x128xi1>, vector<8x128xf32>
    %cst_38 = arith.constant -1.000000e+30 : f32
    %65 = vector.broadcast %cst_38 : f32 to vector<8x128xf32>
    %66 = arith.select %60, %64, %65 : vector<8x128xi1>, vector<8x128xf32>
    %cst_39 = arith.constant dense<0xFF800000> : vector<8xf32>
    %67 = vector.multi_reduction <maximumf>, %66, %cst_39 [1] : vector<8x128xf32> to vector<8xf32>
    %68 = vector.shape_cast %67 : vector<8xf32> to vector<8x1xf32>
    %69 = vector.broadcast %68 : vector<8x1xf32> to vector<8x128xf32>
    %70 = arith.subf %66, %69 : vector<8x128xf32>
    %71 = math.exp %70 : vector<8x128xf32>
    %cst_40 = arith.constant dense<0.000000e+00> : vector<8xf32>
    %72 = vector.multi_reduction <add>, %71, %cst_40 [1] : vector<8x128xf32> to vector<8xf32>
    %73 = vector.shape_cast %72 : vector<8xf32> to vector<8x1xf32>
    %74 = tpu.reciprocal %73 {approx = true} : vector<8x1xf32> -> vector<8x1xf32>
    %75 = vector.broadcast %74 : vector<8x1xf32> to vector<8x128xf32>
    %76 = arith.mulf %71, %75 : vector<8x128xf32>
    %c0_41 = arith.constant 0 : index
    %c0_42 = arith.constant 0 : index
    %77 = vector.load %arg14[%c0_41, %c0_42] : memref<8x128xf32, #tpu.memory_space<vmem>>, vector<8x128xf32>
    tpu.vector_store %arg14[%c0_41, %c0_42], %54 {strides = array<i32>} : memref<8x128xf32, #tpu.memory_space<vmem>>, vector<8x128xf32>,
    %c0_43 = arith.constant 0 : index
    %c0_44 = arith.constant 0 : index
    %78 = vector.load %arg15[%c0_43, %c0_44] : memref<8x128xf32, #tpu.memory_space<vmem>>, vector<8x128xf32>
    tpu.vector_store %arg15[%c0_43, %c0_44], %76 {strides = array<i32>} : memref<8x128xf32, #tpu.memory_space<vmem>>, vector<8x128xf32>,
    return
  }
  func.func @transform_0(%arg0: i32) -> (i32, i32) {
    %c0_i32 = arith.constant 0 : i32
    %c0_i32_0 = arith.constant 0 : i32
    return %arg0, %c0_i32 : i32, i32
  }
  func.func @transform_1(%arg0: i32) -> (i32, i32) {
    %c0_i32 = arith.constant 0 : i32
    %c0_i32_0 = arith.constant 0 : i32
    return %arg0, %c0_i32 : i32, i32
  }
  func.func @transform_2(%arg0: i32) -> (i32, i32) {
    %c0_i32 = arith.constant 0 : i32
    %c0_i32_0 = arith.constant 0 : i32
    return %arg0, %c0_i32 : i32, i32
  }
  func.func @transform_3(%arg0: i32) -> (i32, i32, i32) {
    %c0_i32 = arith.constant 0 : i32
    %c0_i32_0 = arith.constant 0 : i32
    %c0_i32_1 = arith.constant 0 : i32
    return %arg0, %c0_i32, %c0_i32_0 : i32, i32, i32
  }
  func.func @transform_4(%arg0: i32) -> (i32, i32, i32) {
    %c0_i32 = arith.constant 0 : i32
    %c0_i32_0 = arith.constant 0 : i32
    %c0_i32_1 = arith.constant 0 : i32
    return %arg0, %c0_i32, %c0_i32_0 : i32, i32, i32
  }
  func.func @transform_5(%arg0: i32) -> (i32, i32, i32) {
    %c0_i32 = arith.constant 0 : i32
    %c0_i32_0 = arith.constant 0 : i32
    %c0_i32_1 = arith.constant 0 : i32
    return %arg0, %c0_i32, %c0_i32_0 : i32, i32, i32
  }
  func.func @transform_6(%arg0: i32) -> (i32, i32) {
    %c0_i32 = arith.constant 0 : i32
    %c0_i32_0 = arith.constant 0 : i32
    return %arg0, %c0_i32 : i32, i32
  }
  func.func @transform_7(%arg0: i32) -> (i32, i32) {
    %c0_i32 = arith.constant 0 : i32
    %c0_i32_0 = arith.constant 0 : i32
    %c0_i32_1 = arith.constant 0 : i32
    return %c0_i32, %c0_i32_0 : i32, i32
  }
  func.func @transform_8(%arg0: i32) -> (i32, i32) {
    %c0_i32 = arith.constant 0 : i32
    %c0_i32_0 = arith.constant 0 : i32
    %c0_i32_1 = arith.constant 0 : i32
    return %c0_i32, %c0_i32_0 : i32, i32
  }
  func.func @transform_9(%arg0: i32) -> (i32, i32) {
    %c0_i32 = arith.constant 0 : i32
    %c0_i32_0 = arith.constant 0 : i32
    %c0_i32_1 = arith.constant 0 : i32
    return %c0_i32, %c0_i32_0 : i32, i32
  }
  func.func @transform_10(%arg0: i32) -> (i32, i32) {
    %c0_i32 = arith.constant 0 : i32
    %c0_i32_0 = arith.constant 0 : i32
    %c0_i32_1 = arith.constant 0 : i32
    return %c0_i32, %c0_i32_0 : i32, i32
  }
  func.func @transform_11(%arg0: i32) -> i32 {
    %c0_i32 = arith.constant 0 : i32
    %c0_i32_0 = arith.constant 0 : i32
    return %c0_i32 : i32
  }
  func.func @transform_12(%arg0: i32) -> i32 {
    %c0_i32 = arith.constant 0 : i32
    %c0_i32_0 = arith.constant 0 : i32
    return %c0_i32 : i32
  }
  func.func @transform_13(%arg0: i32) -> (i32, i32) {
    %c0_i32 = arith.constant 0 : i32
    %c0_i32_0 = arith.constant 0 : i32
    return %arg0, %c0_i32 : i32, i32
  }
  func.func @transform_14(%arg0: i32) -> (i32, i32) {
    %c0_i32 = arith.constant 0 : i32
    %c0_i32_0 = arith.constant 0 : i32
    return %arg0, %c0_i32 : i32, i32
  }
}

</mosaic_0001>

<bundles_post_ra>
// kernel: ranker_forward.3
= control target key start
LH: loop header
LB: loop body
LE: loop exit
PB: predicated region body
PF: predicated region fallthrough
CT: control target
= control target key end

     0   :  { %21 = vsyncpa [#allocation4], 0  ;;  %s604_s16 = smov [#allocation3]   ;;  %s1009_s0 = inlined_call_operand.vmem [shape: f32[8,128], index: 0, kind: input, shape index: {}]   ;;  %s1010_s1 = inlined_call_operand.vmem [shape: f32[8,128], index: 1, kind: input, shape index: {}]   ;;  %s1011_s2 = inlined_call_operand.vmem [shape: f32[8,128], index: 2, kind: input, shape index: {}]   ;;  %s1012_s3 = inlined_call_operand.vmem [shape: f32[8,4,128], index: 3, kind: input, shape index: {}]   ;;  %s1013_s4 = inlined_call_operand.vmem [shape: f32[8,4,128], index: 4, kind: input, shape index: {}]   ;;  %s1014_s5 = inlined_call_operand.vmem [shape: f32[8,4,128], index: 5, kind: input, shape index: {}]   ;;  %s1015_s6 = inlined_call_operand.vmem [shape: f32[8,4], index: 6, kind: input, shape index: {}]   ;;  %s1016_s7 = inlined_call_operand.vmem [shape: f32[128,128], index: 7, kind: input, shape index: {}]   ;;  %s1017_s8 = inlined_call_operand.vmem [shape: f32[1,128], index: 8, kind: input, shape index: {}]   ;;  %s1018_s9 = inlined_call_operand.vmem [shape: f32[128,128], index: 9, kind: input, shape index: {}]   ;;  %s1019_s10 = inlined_call_operand.vmem [shape: f32[1,128], index: 10, kind: input, shape index: {}]   ;;  %s1020_s11 = inlined_call_operand.vmem [shape: f32[4], index: 11, kind: input, shape index: {}]   ;;  %s1021_s12 = inlined_call_operand.<no memory space> [shape: f32[1], index: 12, kind: input, shape index: {}]   ;;  %s1022_s13 = inlined_call_operand.vmem [shape: f32[8,128], index: 13, kind: output, shape index: {0}]   ;;  %s1023_s14 = inlined_call_operand.vmem [shape: f32[8,128], index: 14, kind: output, shape index: {1}]  }
   0x1   :  { %s49_s15 = sshll.u32 %s1020_s11, 4  ;;  %s50_s15 = int_to_ptr.vmem [resolvable:$true] %s49_s15 }
   0x2   :  { %52 = dma.vmem_to_smem %s50_s15, 16, %s604_s16, [#allocation4]  }
   0x3   :  { %602 = dma.done.wait [#allocation4], 16  }
   0x4   :  { %603 = vsyncadd [#allocation4], 4294967280 }
   0x5   :  { %59 = sfence }
   0x6   :  { %v76_v0 = vld [vmem:[%s1016_s7 + $0x78] sm:$0xff]  ;;  %v75_v1 = vld [vmem:[%s1016_s7 + $0x70] sm:$0xff]  ;;  %s696_s24 = sld [smem:[#allocation3 + $0x3]]  ;;  %v74_v4 = vld [vmem:[%s1016_s7 + $0x68] sm:$0xff]  ;;  %v408_v5 = vlaneseq  ;;  %vm203_vm0 = vcmask 1043456   ;;  %vm531_vm1 = vcmask 1041409  }
   0x7   :  { %v138_v2 = vld [vmem:[%s1018_s9 + $0x78] sm:$0xff]  ;;  %81 = vmatpush.msra.mxu0 %v76_v0  ;;  %102 = vmatpush.msra.mxu1 %v76_v0  ;;  %v137_v3 = vld [vmem:[%s1018_s9 + $0x70] sm:$0xff]  ;;  %v136_v6 = vld [vmem:[%s1018_s9 + $0x68] sm:$0xff]  ;;  %vm533_vm2 = vcmask 1042434   ;;  %vm535_vm3 = vcmask 1043459   ;;  %vm537_vm4 = vcmask 1044484  }
   0x8   :  { %143 = vmatpush.msra.mxu2 %v138_v2  ;;  %v73_v7 = vld [vmem:[%s1016_s7 + $0x60] sm:$0xff]  ;;  %v409_v8 = vshrl.u32 %v408_v5, 7  ;;  %v72_v10 = vld [vmem:[%s1016_s7 + $0x58] sm:$0xff]  ;;  %v71_v12 = vld [vmem:[%s1016_s7 + $0x50] sm:$0xff]  ;;  %vm546_vm5 = vcmask 31744   ;;  %vm539_vm6 = vcmask 1045509  }
   0x9   :  { %82 = vmatpush.msra.mxu0 %v75_v1  ;;  %103 = vmatpush.msra.mxu1 %v75_v1  ;;  %v135_v9 = vld [vmem:[%s1018_s9 + $0x60] sm:$0xff]  ;;  %v134_v11 = vld [vmem:[%s1018_s9 + $0x58] sm:$0xff]  ;;  %v133_v13 = vld [vmem:[%s1018_s9 + $0x50] sm:$0xff]  ;;  %vm541_vm7 = vcmask 1046534   ;;  %vm543_vm8 = vcmask 1047559  }
   0xa   :  { %144 = vmatpush.msra.mxu2 %v137_v3  ;;  %578 = vset.pattern.permute.xlu2 %v409_v8  ;;  %v70_v15 = vld [vmem:[%s1016_s7 + $0x48] sm:$0xff]  ;;  %v733_v17 = vld [vmem:[%s1015_s6] sm:$0xff]  ;;  %v68_v21 = vld [vmem:[%s1016_s7 + $0x38] sm:$0xff] }
   0xb   :  { %83 = vmatpush.msra.mxu0 %v74_v4  ;;  %104 = vmatpush.msra.mxu1 %v74_v4  ;;  %v132_v16 = vld [vmem:[%s1018_s9 + $0x48] sm:$0xff]  ;;  %v69_v18 = vld [vmem:[%s1016_s7 + $0x40] sm:$0xff]  ;;  %v130_v24 = vld [vmem:[%s1018_s9 + $0x38] sm:$0xff] }
   0xc   :  { %145 = vmatpush.msra.mxu2 %v136_v6  ;;  %580 = vset.pattern.permute.xlu1 %v409_v8  ;;  %v404_v14 = vstv %s696_s24  ;;  %v131_v20 = vld [vmem:[%s1018_s9 + $0x40] sm:$0xff]  ;;  %v67_v25 = vld [vmem:[%s1016_s7 + $0x30] sm:$0xff]  ;;  %v66_v28 = vld [vmem:[%s1016_s7 + $0x28] sm:$0xff] }
   0xd   :  { %84 = vmatpush.msra.mxu0 %v73_v7  ;;  %105 = vmatpush.msra.mxu1 %v73_v7  ;;  %v739_v19 = vmul.f32 %v404_v14, %v733_v17  ;;  %v129_v27 = vld [vmem:[%s1018_s9 + $0x30] sm:$0xff]  ;;  %v128_v29 = vld [vmem:[%s1018_s9 + $0x28] sm:$0xff]  ;;  %v65_v30 = vld [vmem:[%s1016_s7 + $0x20] sm:$0xff] }
   0xe   :  { %146 = vmatpush.msra.mxu2 %v135_v9  ;;  %579 = vset.pattern.permute.xlu0 %v409_v8  ;;  %v127_v32 = vld [vmem:[%s1018_s9 + $0x20] sm:$0xff]  ;;  %v64_v33 = vld [vmem:[%s1016_s7 + $0x18] sm:$0xff]  ;;  %v63_v36 = vld [vmem:[%s1016_s7 + $0x10] sm:$0xff] }
   0xf   :  { %85 = vmatpush.msra.mxu0 %v72_v10  ;;  %106 = vmatpush.msra.mxu1 %v72_v10  ;;  %v407_v22 = vperm.slane %v739_v19, 0  ;;  %v421_v23 = vperm.slane %v739_v19, 2  ;;  %v414_v26 = vperm.slane %v739_v19, 1  ;;  %v428_v31 = vperm.slane %v739_v19, 3  ;;  %v126_v35 = vld [vmem:[%s1018_s9 + $0x18] sm:$0xff]  ;;  %v125_v37 = vld [vmem:[%s1018_s9 + $0x10] sm:$0xff] }
  0x10   :  { %147 = vmatpush.msra.mxu2 %v134_v11  ;;  %v449_v34 = vperm.slane %v739_v19, 6  ;;  %v62_v38 = vld [vmem:[%s1016_s7 + $0x8] sm:$0xff]  ;;  %v61_v40 = vld [vmem:[%s1016_s7] sm:$0xff]  ;;  %v435_v43 = vperm.slane %v739_v19, 4  ;;  %v442_v46 = vperm.slane %v739_v19, 5 }
  0x11   :  { %86 = vmatpush.msra.mxu0 %v71_v12  ;;  %107 = vmatpush.msra.mxu1 %v71_v12  ;;  %v124_v39 = vld [vmem:[%s1018_s9 + $0x8] sm:$0xff]  ;;  %v60_v41 = vld [vmem:[%s1009_s0] sm:$0xff]  ;;  %s357_s0 = sld [smem:[#allocation3]] }
  0x12   :  { %148 = vmatpush.msra.mxu2 %v133_v13  ;;  %412 = vperm.xlu2 %578, %v407_v22   ;;  %v101_v42 = vld [vmem:[%s1010_s1] sm:$0xff]  ;;  %v294_v58 = vld [vmem:[%s1014_s5 + $0x8] sm:$0xf]  ;;  %v295_v2 = vld [vmem:[%s1014_s5 + $0xc] sm:$0xf]  ;;  %s574_s1 = sld [smem:[#allocation3 + $0x2]] }
  0x13   :  { %87 = vmatpush.msra.mxu0 %v70_v15  ;;  %108 = vmatpush.msra.mxu1 %v70_v15  ;;  %v123_v44 = vld [vmem:[%s1018_s9] sm:$0xff] }
  0x14   :  { %149 = vmatpush.msra.mxu2 %v132_v16  ;;  %426 = vperm.xlu1 %580, %v421_v23   ;;  %v122_v45 = vld [vmem:[%s1011_s2] sm:$0xff] }
  0x15   :  { %88 = vmatpush.msra.mxu0 %v69_v18  ;;  %109 = vmatpush.msra.mxu1 %v69_v18  ;;  %v584_v47 = vld [vmem:[%s1017_s8] ss:$0 sm:$0xff]  ;;  %v293_v1 = vld [vmem:[%s1014_s5 + $0x4] sm:$0xf]  ;;  %v230_v18 = vld [vmem:[%s1013_s4 + $0x8] sm:$0xf] }
  0x16   :  { %150 = vmatpush.msra.mxu2 %v131_v20  ;;  %419 = vperm.xlu0 %579, %v414_v26   ;;  %v292_v52 = vld [vmem:[%s1014_s5] sm:$0xf] }
  0x17   :  { %89 = vmatpush.msra.mxu0 %v68_v21  ;;  %110 = vmatpush.msra.mxu1 %v68_v21  ;;  %v163_v53 = vld [vmem:[%s1012_s3] sm:$0xf] }
  0x18   :  { %151 = vmatpush.msra.mxu2 %v130_v24  ;;  %v585_v60 = vld [vmem:[%s1019_s10] ss:$0 sm:$0xff] }
  0x19   :  { %90 = vmatpush.msra.mxu0 %v67_v25  ;;  %111 = vmatpush.msra.mxu1 %v67_v25 }
  0x1a   :  { %152 = vmatpush.msra.mxu2 %v129_v27  ;;  %433 = vperm.xlu2 %578, %v428_v31   ;;  %v296_v27 = vld [vmem:[%s1014_s5 + $0x10] sm:$0xf] }
  0x1b   :  { %91 = vmatpush.msra.mxu0 %v66_v28  ;;  %112 = vmatpush.msra.mxu1 %v66_v28  ;;  %v164_v28 = vld [vmem:[%s1012_s3 + $0x4] sm:$0xf] }
  0x1c   :  { %153 = vmatpush.msra.mxu2 %v128_v29  ;;  %454 = vperm.xlu1 %580, %v449_v34   ;;  %v231_v29 = vld [vmem:[%s1013_s4 + $0xc] sm:$0xf] }
  0x1d   :  { %92 = vmatpush.msra.mxu0 %v65_v30  ;;  %113 = vmatpush.msra.mxu1 %v65_v30 }
  0x1e   :  { %154 = vmatpush.msra.mxu2 %v127_v32 }
  0x1f   :  { %93 = vmatpush.msra.mxu0 %v64_v33  ;;  %114 = vmatpush.msra.mxu1 %v64_v33 }
  0x20   :  { %155 = vmatpush.msra.mxu2 %v126_v35 }
  0x21   :  { %94 = vmatpush.msra.mxu0 %v63_v36  ;;  %115 = vmatpush.msra.mxu1 %v63_v36 }
  0x22   :  { %156 = vmatpush.msra.mxu2 %v125_v37  ;;  %440 = vperm.xlu2 %578, %v435_v43   ;;  %v297_v43 = vld [vmem:[%s1014_s5 + $0x14] sm:$0xf] }
  0x23   :  { %95 = vmatpush.msra.mxu0 %v62_v38  ;;  %116 = vmatpush.msra.mxu1 %v62_v38  ;;  %v165_v38 = vld [vmem:[%s1012_s3 + $0x8] sm:$0xf] }
  0x24   :  { %157 = vmatpush.msra.mxu2 %v124_v39 }
  0x25   :  { %96 = vmatpush.msra.mxu0 %v61_v40  ;;  %117 = vmatpush.msra.mxu1 %v61_v40 }
  0x26   :  { %97 = vmatmul.f32.vlgmr.msra.gmra.mxu0 %v60_v41  ;;  %118 = vmatmul.f32.vlgmr.msra.gmra.mxu1 %v101_v42 }
  0x27   :  { %158 = vmatpush.msra.mxu2 %v123_v44 }
  0x28   :  { %159 = vmatmul.f32.vlgmr.msra.gmra.mxu2 %v122_v45  ;;  %v232_v45 = vld [vmem:[%s1013_s4 + $0x10] sm:$0xf] }
  0x2a   :  { %447 = vperm.xlu2 %578, %v442_v46  }
  0xa3   :  { %v98_v48 = vpop.f32.mrf.mxu0  ;;  %v119_v49 = vpop.f32.mrf.mxu1 }
  0xa4   :  { %v811_v50 = vadd.f32 %v584_v47, %v98_v48  ;;  %v813_v51 = vadd.f32 %v584_v47, %v119_v49 }
  0xa6   :  { %v308_v54 = vperm.slane %v813_v51, 0  ;;  %v179_v55 = vperm.slane %v811_v50, 0  ;;  %v302_v56 = vrot.slane %v813_v51, 2  ;;  %v301_v57 = vrot.slane %v813_v51, 1 }
  0xa7   :  { %v303_v59 = vrot.slane %v813_v51, 3  ;;  %v304_v14 = vrot.slane %v813_v51, 4  ;;  %v172_v15 = vrot.slane %v811_v50, 1  ;;  %v305_v31 = vrot.slane %v813_v51, 5 }
  0xa8   :  { %v324_v61 = vmul.f32 %v308_v54, %v292_v52  ;;  %v195_v62 = vmul.f32 %v179_v55, %v163_v53  ;;  %v310_v63 = vperm.slane %v302_v56, 0  ;;  %v309_v0 = vperm.slane %v301_v57, 0 }
  0xa9   :  { %v311_v3 = vperm.slane %v303_v59, 0  ;;  %v312_v24 = vperm.slane %v304_v14, 0  ;;  %v180_v25 = vperm.slane %v172_v15, 0  ;;  %v173_v32 = vrot.slane %v811_v50, 2  ;;  %v234_v14 = vld [vmem:[%s1013_s4 + $0x18] sm:$0xf] }
  0xaa   :  { %v332_v4 = vsel %vm203_vm0, %v324_v61, 0.0  ;;  %v204_v6 = vsel %vm203_vm0, %v195_v62, 0.0  ;;  %v326_v7 = vmul.f32 %v310_v63, %v294_v58  ;;  %v325_v11 = vmul.f32 %v309_v0, %v293_v1  ;;  %v166_v61 = vld [vmem:[%s1012_s3 + $0xc] sm:$0xf]  ;;  %v233_v62 = vld [vmem:[%s1013_s4 + $0x14] sm:$0xf] }
  0xab   :  { %v160_v8 = vpop.f32.mrf.mxu2  ;;  %333 = vadd.xlane.f32.xlu1 %v332_v4  ;;  %205 = vadd.xlane.f32.xlu0 %v204_v6  ;;  %v327_v12 = vmul.f32 %v311_v3, %v295_v2  ;;  %v328_v33 = vmul.f32 %v312_v24, %v296_v27  ;;  %v196_v34 = vmul.f32 %v180_v25, %v164_v28  ;;  %v313_v37 = vperm.slane %v305_v31, 0  ;;  %v168_v27 = vld [vmem:[%s1012_s3 + $0x14] sm:$0xf] }
  0xac   :  { %v840_v9 = vadd.f32 %v585_v60, %v160_v8  ;;  %v338_v10 = vsel %vm203_vm0, %v326_v7, 0.0  ;;  %v335_v20 = vsel %vm203_vm0, %v325_v11, 0.0  ;;  %v181_v39 = vperm.slane %v173_v32, 0  ;;  %v298_v60 = vld [vmem:[%s1014_s5 + $0x18] sm:$0xf] }
  0xad   :  { %339 = vadd.xlane.f32.xlu2 %v338_v10  ;;  %v341_v21 = vsel %vm203_vm0, %v327_v12, 0.0  ;;  %v344_v40 = vsel %vm203_vm0, %v328_v33, 0.0  ;;  %v207_v41 = vsel %vm203_vm0, %v196_v34, 0.0  ;;  %v329_v46 = vmul.f32 %v313_v37, %v297_v43  ;;  %v167_v12 = vld [vmem:[%s1012_s3 + $0x10] sm:$0xf] }
  0xae   :  { %v238_v13 = vrot.slane %v840_v9, 2  ;;  %v239_v16 = vrot.slane %v840_v9, 3  ;;  %v240_v36 = vrot.slane %v840_v9, 4  ;;  %v197_v47 = vmul.f32 %v181_v39, %v165_v38 }
  0xaf   :  { %v306_v49 = vrot.slane %v813_v51, 6  ;;  %v174_v52 = vrot.slane %v811_v50, 3  ;;  %v241_v53 = vrot.slane %v840_v9, 5  ;;  %v347_v54 = vsel %vm203_vm0, %v329_v46, 0.0 }
  0xb0   :  { %v246_v22 = vperm.slane %v238_v13, 0  ;;  %v247_v26 = vperm.slane %v239_v16, 0  ;;  %v248_v44 = vperm.slane %v240_v36, 0  ;;  %v210_v55 = vsel %vm203_vm0, %v197_v47, 0.0 }
  0xb1   :  { %v314_v57 = vperm.slane %v306_v49, 0  ;;  %v182_v58 = vperm.slane %v174_v52, 0  ;;  %v249_v59 = vperm.slane %v241_v53, 0  ;;  %v307_v63 = vrot.slane %v813_v51, 7  ;;  %v299_v51 = vld [vmem:[%s1014_s5 + $0x1c] sm:$0xf] }
  0xb2   :  { %v262_v23 = vmul.f32 %v246_v22, %v230_v18  ;;  %v263_v35 = vmul.f32 %v247_v26, %v231_v29  ;;  %v264_v48 = vmul.f32 %v248_v44, %v232_v45  ;;  %v175_v3 = vrot.slane %v811_v50, 4  ;;  %v228_v26 = vld [vmem:[%s1013_s4] sm:$0xf] }
  0xb3   :  { %336 = vadd.xlane.f32.xlu1 %v335_v20  ;;  %342 = vadd.xlane.f32.xlu0 %v341_v21  ;;  %v330_v0 = vmul.f32 %v314_v57, %v298_v60  ;;  %v198_v1 = vmul.f32 %v182_v58, %v166_v61  ;;  %v265_v2 = vmul.f32 %v249_v59, %v233_v62  ;;  %v242_v4 = vrot.slane %v840_v9, 6  ;;  %v945_v57 = vpop.permute.xlu0 %419 }
  0xb4   :  { %v274_v30 = vsel %vm203_vm0, %v262_v23, 0.0  ;;  %v277_v42 = vsel %vm203_vm0, %v263_v35, 0.0  ;;  %v280_v56 = vsel %vm203_vm0, %v264_v48, 0.0  ;;  %v315_v6 = vperm.slane %v307_v63, 0  ;;  %v170_v48 = vld [vmem:[%s1012_s3 + $0x1c] sm:$0xf] }
  0xb5   :  { %275 = vadd.xlane.f32.xlu2 %v274_v30  ;;  %v350_v7 = vsel %vm203_vm0, %v330_v0, 0.0  ;;  %v213_v8 = vsel %vm203_vm0, %v198_v1, 0.0  ;;  %v283_v10 = vsel %vm203_vm0, %v265_v2, 0.0  ;;  %v183_v11 = vperm.slane %v175_v3, 0  ;;  %v235_v30 = vld [vmem:[%s1013_s4 + $0x1c] sm:$0xf] }
  0xb6   :  { %v250_v13 = vperm.slane %v242_v4, 0  ;;  %v331_v15 = vmul.f32 %v315_v6, %v299_v51  ;;  %v176_v18 = vrot.slane %v811_v50, 5  ;;  %v243_v21 = vrot.slane %v840_v9, 7 }
  0xb7   :  { %v199_v16 = vmul.f32 %v183_v11, %v167_v12  ;;  %v244_v24 = vperm.slane %v840_v9, 0  ;;  %v237_v33 = vrot.slane %v840_v9, 1  ;;  %v177_v34 = vrot.slane %v811_v50, 6 }
  0xb8   :  { %v266_v20 = vmul.f32 %v250_v13, %v234_v14  ;;  %v353_v22 = vsel %vm203_vm0, %v331_v15, 0.0  ;;  %v184_v25 = vperm.slane %v176_v18, 0  ;;  %v251_v29 = vperm.slane %v243_v21, 0 }
  0xb9   :  { %v216_v23 = vsel %vm203_vm0, %v199_v16, 0.0  ;;  %v260_v31 = vmul.f32 %v244_v24, %v228_v26  ;;  %v245_v38 = vperm.slane %v237_v33, 0  ;;  %v185_v39 = vperm.slane %v177_v34, 0 }
  0xba   :  { %v286_v28 = vsel %vm203_vm0, %v266_v20, 0.0  ;;  %v200_v32 = vmul.f32 %v184_v25, %v168_v27  ;;  %v267_v35 = vmul.f32 %v251_v29, %v235_v30  ;;  %v178_v44 = vrot.slane %v811_v50, 7 }
  0xbb   :  { %345 = vadd.xlane.f32.xlu0 %v344_v40  ;;  %208 = vadd.xlane.f32.xlu1 %v207_v41  ;;  %v268_v36 = vsel %vm203_vm0, %v260_v31, 0.0  ;;  %v229_v40 = vld [vmem:[%s1013_s4 + $0x4] sm:$0xf]  ;;  %v169_v41 = vld [vmem:[%s1012_s3 + $0x18] sm:$0xf]  ;;  %v456_v53 = vperm.slane %v739_v19, 7  ;;  %v963_v16 = vstv %s1021_s12 }
  0xbc   :  { %v219_v37 = vsel %vm203_vm0, %v200_v32, 0.0  ;;  %v289_v9 = vsel %vm203_vm0, %v267_v35, 0.0  ;;  %v201_v43 = vmul.f32 %v185_v39, %v169_v41  ;;  %v186_v47 = vperm.slane %v178_v44, 0  ;;  %s573_s3 = sld [smem:[#allocation3 + $0x1]] }
  0xbd   :  { %278 = vadd.xlane.f32.xlu2 %v277_v42  ;;  %v261_v42 = vmul.f32 %v245_v38, %v229_v40  ;;  %v605_v60 = vmov 0  }
  0xbe   :  { %v222_v46 = vsel %vm203_vm0, %v201_v43, 0.0  ;;  %v202_v49 = vmul.f32 %v186_v47, %v170_v48  ;;  %581 = vset.pattern.permute.xlu2 %v605_v60  ;;  %582 = vset.pattern.permute.xlu1 %v605_v60 }
  0xbf   :  { %v271_v45 = vsel %vm203_vm0, %v261_v42, 0.0 }
  0xc0   :  { %v225_v52 = vsel %vm203_vm0, %v202_v49, 0.0 }
  0xc2   :  { %v951_v4 = vstv %s573_s3 }
  0xc3   :  { %348 = vadd.xlane.f32.xlu0 %v347_v54  ;;  %211 = vadd.xlane.f32.xlu1 %v210_v55  ;;  %v413_v54 = vpop.permute.xlu2 %412  ;;  %v427_v55 = vpop.permute.xlu1 %426 }
  0xc5   :  { %281 = vadd.xlane.f32.xlu2 %v280_v56 }
  0xcb   :  { %351 = vadd.xlane.f32.xlu0 %v350_v7  ;;  %214 = vadd.xlane.f32.xlu1 %v213_v8  ;;  %v941_v50 = vpop.permute.xlu2 %433  ;;  %v947_v58 = vpop.permute.xlu1 %454  ;;  %v954_v7 = vstv %s357_s0 }
  0xcd   :  { %284 = vadd.xlane.f32.xlu2 %v283_v10  ;;  %v957_v10 = vstv %s574_s1 }
  0xd3   :  { %354 = vadd.xlane.f32.xlu0 %v353_v22  ;;  %217 = vadd.xlane.f32.xlu1 %v216_v23  ;;  %v943_v56 = vpop.permute.xlu2 %440 }
  0xd5   :  { %287 = vadd.xlane.f32.xlu2 %v286_v28 }
  0xdb   :  { %269 = vadd.xlane.f32.xlu0 %v268_v36  ;;  %220 = vadd.xlane.f32.xlu1 %v219_v37  ;;  %v949_v59 = vpop.permute.xlu2 %447 }
  0xdd   :  { %290 = vadd.xlane.f32.xlu2 %v289_v9 }
  0xe3   :  { %272 = vadd.xlane.f32.xlu0 %v271_v45  ;;  %223 = vadd.xlane.f32.xlu1 %v222_v46 }
  0xeb   :  { %226 = vadd.xlane.f32.xlu1 %v225_v52 }
  0xf7   :  { %461 = vperm.xlu0 %579, %v456_v53  }
  0xff   :  { %583 = vset.pattern.permute.xlu0 %v605_v60 }
 0x11e   :  { %v334_v61 = vpop.xlane.xlu1 %333  ;;  %v206_v62 = vpop.xlane.xlu0 %205 }
 0x11f   :  { %v359_v29 = vmul.f32 %v954_v7, %v334_v61  ;;  %v387_v31 = vmul.f32 %v957_v10, %v206_v62 }
 0x120   :  { %v340_v19 = vpop.xlane.xlu2 %339 }
 0x121   :  { %v361_v8 = vmul.f32 %v954_v7, %v340_v19 }
 0x126   :  { %v337_v63 = vpop.xlane.xlu1 %336  ;;  %v343_v0 = vpop.xlane.xlu0 %342 }
 0x127   :  { %v362_v34 = vmul.f32 %v954_v7, %v343_v0  ;;  %v360_v41 = vmul.f32 %v954_v7, %v337_v63 }
 0x128   :  { %v276_v1 = vpop.xlane.xlu2 %275 }
 0x129   :  { %v371_v6 = vmul.f32 %v951_v4, %v276_v1 }
 0x12b   :  { %v379_v12 = vadd.f32 %v371_v6, %v361_v8 }
 0x12e   :  { %v346_v2 = vpop.xlane.xlu0 %345  ;;  %v209_v3 = vpop.xlane.xlu1 %208 }
 0x12f   :  { %v388_v45 = vmul.f32 %v957_v10, %v209_v3  ;;  %v363_v49 = vmul.f32 %v954_v7, %v346_v2 }
 0x130   :  { %v279_v13 = vpop.xlane.xlu2 %278 }
 0x131   :  { %v372_v32 = vmul.f32 %v951_v4, %v279_v13 }
 0x133   :  { %v380_v37 = vadd.f32 %v372_v32, %v362_v34 }
 0x136   :  { %v349_v11 = vpop.xlane.xlu0 %348  ;;  %v212_v51 = vpop.xlane.xlu1 %211 }
 0x137   :  { %v389_v14 = vmul.f32 %v957_v10, %v212_v51  ;;  %v364_v52 = vmul.f32 %v954_v7, %v349_v11 }
 0x138   :  { %v282_v23 = vpop.xlane.xlu2 %281 }
 0x139   :  { %v397_v15 = vadd.f32 %v389_v14, %v379_v12  ;;  %v373_v46 = vmul.f32 %v951_v4, %v282_v23 }
 0x13b   :  { %v473_v18 = vadd.f32 %v427_v55, %v397_v15  ;;  %v381_v61 = vadd.f32 %v373_v46, %v363_v49 }
 0x13d   :  { %v483_v20 = vadd.f32 %v963_v16, %v473_v18 }
 0x13e   :  { %v352_v21 = vpop.xlane.xlu0 %351  ;;  %v215_v22 = vpop.xlane.xlu1 %214 }
 0x13f   :  { %504 = vperm.xlu0 %583, %v483_v20   ;;  %v390_v35 = vmul.f32 %v957_v10, %v215_v22  ;;  %v365_v11 = vmul.f32 %v954_v7, %v352_v21 }
 0x140   :  { %v285_v26 = vpop.xlane.xlu2 %284 }
 0x141   :  { %v398_v9 = vadd.f32 %v390_v35, %v380_v37  ;;  %v374_v47 = vmul.f32 %v951_v4, %v285_v26  ;;  %v522_v26 = vand.u32 127, %v408_v5 }
 0x143   :  { %v474_v53 = vadd.f32 %v941_v50, %v398_v9  ;;  %v382_v62 = vadd.f32 %v374_v47, %v364_v52  ;;  %vm549_vm10 = vcmp.lt.s32.totalorder %v522_v26, 4 }
 0x145   :  { %v484_v2 = vadd.f32 %v963_v16, %v474_v53 }
 0x146   :  { %v355_v24 = vpop.xlane.xlu0 %354  ;;  %v218_v25 = vpop.xlane.xlu1 %217 }
 0x147   :  { %v366_v13 = vmul.f32 %v954_v7, %v355_v24 }
 0x148   :  { %v288_v38 = vpop.xlane.xlu2 %287 }
 0x149   :  { %v375_v6 = vmul.f32 %v951_v4, %v288_v38 }
 0x14b   :  { %v383_v15 = vadd.f32 %v375_v6, %v365_v11 }
 0x14e   :  { %v270_v27 = vpop.xlane.xlu0 %269  ;;  %v221_v28 = vpop.xlane.xlu1 %220 }
 0x14f   :  { %v369_v30 = vmul.f32 %v951_v4, %v270_v27  ;;  %v392_v55 = vmul.f32 %v957_v10, %v221_v28 }
 0x150   :  { %v291_v1 = vpop.xlane.xlu2 %290 }
 0x151   :  { %v377_v33 = vadd.f32 %v369_v30, %v359_v29  ;;  %v400_v0 = vadd.f32 %v392_v55, %v382_v62  ;;  %v376_v50 = vmul.f32 %v951_v4, %v291_v1 }
 0x153   :  { %v395_v36 = vadd.f32 %v387_v31, %v377_v33  ;;  %v384_v18 = vadd.f32 %v376_v50, %v366_v13 }
 0x155   :  { %v471_v39 = vadd.f32 %v413_v54, %v395_v36  ;;  %v391_v54 = vmul.f32 %v957_v10, %v218_v25 }
 0x156   :  { %v273_v40 = vpop.xlane.xlu0 %272  ;;  %v224_v43 = vpop.xlane.xlu1 %223 }
 0x157   :  { %v370_v42 = vmul.f32 %v951_v4, %v273_v40  ;;  %v481_v44 = vadd.f32 %v963_v16, %v471_v39  ;;  %v399_v63 = vadd.f32 %v391_v54, %v381_v61  ;;  %v393_v12 = vmul.f32 %v957_v10, %v224_v43 }
 0x158   :  { %v548_v40 = vsel %vm546_vm5, %v733_v17, 0.0 }
 0x159   :  { %v378_v48 = vadd.f32 %v370_v42, %v360_v41  ;;  %498 = vperm.xlu2 %581, %v481_v44   ;;  %v475_v51 = vadd.f32 %v943_v56, %v399_v63  ;;  %v401_v20 = vadd.f32 %v393_v12, %v383_v15  ;;  %vm550_vm9 = vcmp.eq.f32.partialorder %v548_v40, 0.0 }
 0x15b   :  { %v396_v60 = vadd.f32 %v388_v45, %v378_v48  ;;  %v485_v22 = vadd.f32 %v963_v16, %v475_v51 }
 0x15d   :  { %v472_v19 = vadd.f32 %v945_v57, %v396_v60  ;;  %v476_v57 = vadd.f32 %v949_v59, %v400_v0  ;;  %v477_v59 = vadd.f32 %v947_v58, %v401_v20 }
 0x15e   :  { %v227_v8 = vpop.xlane.xlu1 %226 }
 0x15f   :  { %v482_v3 = vadd.f32 %v963_v16, %v472_v19  ;;  %v394_v14 = vmul.f32 %v957_v10, %v227_v8  ;;  %v486_v23 = vadd.f32 %v963_v16, %v476_v57  ;;  %v487_v7 = vadd.f32 %v963_v16, %v477_v59 }
 0x161   :  { %501 = vperm.xlu1 %582, %v482_v3   ;;  %507 = vperm.xlu2 %581, %v484_v2   ;;  %v402_v4 = vadd.f32 %v394_v14, %v384_v18 }
 0x169   :  { %v462_v25 = vpop.permute.xlu0 %461  ;;  %510 = vperm.xlu1 %582, %v485_v22   ;;  %513 = vperm.xlu2 %581, %v486_v23  }
 0x16a   :  { %v478_v56 = vadd.f32 %v462_v25, %v402_v4 }
 0x16c   :  { %v488_v21 = vadd.f32 %v963_v16, %v478_v56 }
 0x16e   :  { %519 = vperm.xlu0 %583, %v488_v21  }
 0x171   :  { %516 = vperm.xlu1 %582, %v487_v7  }
 0x1b1   :  { %v505_v29 = vpop.permute.xlu0 %504 }
 0x1b2   :  { %v525_v33 = vperm.slane %v505_v29, %v522_v26 }
 0x1b3   :  { %v499_v10 = vpop.permute.xlu2 %498 }
 0x1b4   :  { %v523_v30 = vperm.slane %v499_v10, %v522_v26 }
 0x1bb   :  { %v508_v27 = vpop.permute.xlu2 %507 }
 0x1bc   :  { %v526_v35 = vperm.slane %v508_v27, %v522_v26 }
 0x1c3   :  { %v514_v16 = vpop.permute.xlu2 %513 }
 0x1c4   :  { %v528_v5 = vperm.slane %v514_v16, %v522_v26 }
 0x1d3   :  { %v502_v24 = vpop.permute.xlu1 %501 }
 0x1d4   :  { %v524_v28 = vperm.slane %v502_v24, %v522_v26 }
 0x1d6   :  { %v532_v31 = vsel %vm531_vm1, %v524_v28, %v523_v30 }
 0x1d7   :  { %v534_v58 = vsel %vm533_vm2, %v525_v33, %v532_v31 }
 0x1d8   :  { %v536_v36 = vsel %vm535_vm3, %v526_v35, %v534_v58 }
 0x1db   :  { %v511_v32 = vpop.permute.xlu1 %510 }
 0x1dc   :  { %v527_v34 = vperm.slane %v511_v32, %v522_v26 }
 0x1de   :  { %v538_v37 = vsel %vm537_vm4, %v527_v34, %v536_v36 }
 0x1df   :  { %v540_v42 = vsel %vm539_vm6, %v528_v5, %v538_v37 }
 0x1e0   :  { %v520_v38 = vpop.permute.xlu0 %519 }
 0x1e1   :  { %v530_v9 = vperm.slane %v520_v38, %v522_v26 }
 0x1e3   :  { %v517_v39 = vpop.permute.xlu1 %516 }
 0x1e4   :  { %v529_v41 = vperm.slane %v517_v39, %v522_v26 }
 0x1e6   :  { %v542_v43 = vsel %vm541_vm7, %v529_v41, %v540_v42 }
 0x1e7   :  { %v544_v44 = vsel %vm543_vm8, %v530_v9, %v542_v43 }
 0x1e8   :  { %v547_v45 = vsel %vm546_vm5, %v544_v44, 0.0 }
 0x1e9   :  { %v551_v46 = vsel %vm550_vm9, -1e+10, %v547_v45  ;;  %562 = vst [vmem:[%s1022_s13] sm:$0xff] %v547_v45 }
 0x1ea   :  { %v552_v47 = vsel %vm549_vm10, %v551_v46, -1e+30 }
 0x1eb   :  { %553 = vmax.xlane.f32.xlu2 %v552_v47 }
 0x25e   :  { %v554_v48 = vpop.xlane.xlu2 %553 }
 0x25f   :  { %v555_v49 = vsub.f32 %v552_v47, %v554_v48 }
 0x261   :  { %v556_v17 = vmul.f32 1.442695, %v555_v49 }
 0x263   :  { %586 = vpow2.f32 %v556_v17 }
 0x269   :  { %v587_v52 = vpop.eup %586 }
 0x26a   :  { %558 = vadd.xlane.f32.xlu1 %v587_v52 }
 0x2dd   :  { %v559_v53 = vpop.xlane.xlu1 %558 }
 0x2de   :  { %588 = vrcp.f32 %v559_v53 }
 0x2e4   :  { %v589_v54 = vpop.eup %588 }
 0x2e5   :  { %v561_v55 = vmul.f32 %v589_v54, %v587_v52 }
 0x2e7   :  { %563 = vst [vmem:[%s1023_s14] sm:$0xff] %v561_v55 }
 0x2e8   :  { %572 = vsyncpa [#allocation4], 1 }

// kernel: ranker_forward.2
= control target key start
LH: loop header
LB: loop body
LE: loop exit
PB: predicated region body
PF: predicated region fallthrough
CT: control target
= control target key end

     0   :  { %s2400_s15 = smov 0   ;;  %s2402_s16 = smov 0   ;;  %s3211_s0 = inlined_call_operand.vmem [shape: bf16[768,32], index: 0, kind: input, shape index: {}]   ;;  %s3212_s1 = inlined_call_operand.vmem [shape: bf16[3,5,32,128], index: 1, kind: input, shape index: {}]   ;;  %s3213_s2 = inlined_call_operand.vmem [shape: f32[3,1,128], index: 2, kind: input, shape index: {}]   ;;  %s3214_s3 = inlined_call_operand.vmem [shape: s32[48,1], index: 3, kind: input, shape index: {}]   ;;  %s3215_s4 = inlined_call_operand.vmem [shape: f32[48,128], index: 4, kind: output, shape index: {}]  }
   0x1   :  { %s2404_s17 = smov 0  }
   0x2 LB: > { %s26_s18 = sadd.s32 1, %s2368_s16  ;;  %p2074_p0 = scmp.ge.s32.totalorder %s2372_s17, 1  ;;  %s2372_s17 = sphi %s2404_s17, %s14_s17   ;;  %s2368_s16 = sphi %s2402_s16, %s3254_s16   ;;  %s2364_s15 = sphi %s2400_s15, %s3253_s15  }
   0x3   : > { %p28_p1 = scmp.ge.s32.totalorder %s26_s18, 3  ;;  %p214_p2 = scmp.lt.s32.totalorder %s2372_s17, 4 }
   0x5   : > { %s3256_s18 = smov (%p28_p1, %s26_s18), 0  ;;  %p215_p3 = pnand %p2074_p0, %p214_p2 }
   0x7   : > { %218 = sbr.rel (%p215_p3) target bundleno = 501 (0x1f5), region = 36 }
   0xc   : > { %p264_p4 = scmp.lt.s32.totalorder %s2364_s15, 2  ;;  %s2075_s19 = sshll.u32 %s2364_s15, 5  ;;  %vm410_vm0 = vsmask.f32 7424  ;;  %vm555_vm1 = vcmask 261120   ;;  %vm832_vm4 = vcmask 1046528  }
   0xd   : > { %p258_p5 = scmp.lt.s32.totalorder %s2075_s19, 95  ;;  %s2078_s6 = sshll.u32 %s2364_s15, 1  ;;  %vm1052_vm5 = vsmask.f32 6400  ;;  %vm1308_vm6 = vcmask 1045504  }
   0xe   : > { %s2423_s20 = scalar_select %p264_p4, %s2364_s15, 2 }
   0xf   : > { %s3258_s19 = smov (!%p258_p5, %s2075_s19), 95  ;;  %p274_p6 = scmp.lt.s32.totalorder %s2078_s6, 5 }
  0x10   : > { %s2316_s21 = smul.u32 80, %s2423_s20  ;;  %s271_s24 = scalar_lea.vmem %s3213_s2, %s2423_s20 }
  0x11   : > { %s2076_s25 = sshll.u32 %s3258_s19, 2  ;;  %s3260_s6 = smov (!%p274_p6, %s2078_s6), 5 }
  0x12   : > { %s2433_s28 = scalar_lea.vmem %s3212_s1, %s2316_s21  ;;  %s2438_s5 = scalar_lea.vmem %s3211_s0, %s2076_s25 }
  0x13   : > { %v2303_v0 = vld [vmem:[%s2433_s28 + $0x18] sm:$0xff]  ;;  %v2442_v1 = vld [vmem:[%s2438_s5 + $0x20] sm:$0xff]  ;;  %v2445_v2 = vld [vmem:[%s2438_s5 + $0x28] sm:$0xff]  ;;  %s2079_s7 = sshll.u32 %s3260_s6, 3 }
  0x14   : > { %v2448_v3 = vld [vmem:[%s2438_s5 + $0x40] sm:$0xff]  ;;  %v2451_v4 = vld [vmem:[%s2438_s5 + $0x48] sm:$0xff]  ;;  %2310 = vmatpush.bf16.msra.mxu1 %v2303_v0  ;;  %2311 = vmatpush.bf16.msra.mxu2 %v2303_v0  ;;  %v2302_v5 = vld [vmem:[%s2433_s28 + $0x10] sm:$0xff]  ;;  %v443_v6 = vshll.u32 %v2442_v1, 16  ;;  %v447_v7 = vshrl.u32 %v2442_v1, 16  ;;  %v451_v10 = vshll.u32 %v2445_v2, 16  ;;  %s2649_s10 = scalar_lea.vmem %s3214_s3, %s2079_s7  ;;  %s3165_s15 = scalar_lea.vmem %s3215_s4, %s2079_s7 }
  0x15   : > { %v2457_v8 = vld [vmem:[%s2438_s5 + $0x60] sm:$0xff]  ;;  %v2460_v9 = vld [vmem:[%s2438_s5 + $0x68] sm:$0xff]  ;;  %2312 = vmatpush.bf16.msra.mxu3 %v2303_v0  ;;  %610 = vmatpush.bf16.msra.mxu0 %v2303_v0  ;;  %v475_v11 = vshll.u32 %v2448_v3, 16  ;;  %v479_v12 = vshrl.u32 %v2448_v3, 16  ;;  %v483_v13 = vshll.u32 %v2451_v4, 16  ;;  %v2307_v21 = vld [vmem:[%s2433_s28 + $0x38] sm:$0xff] }
  0x16   : > { %v2467_v14 = vld [vmem:[%s2438_s5] sm:$0xff]  ;;  %v2470_v15 = vld [vmem:[%s2438_s5 + $0x8] sm:$0xff]  ;;  %v2474_v16 = vrot.slane %v443_v6, 1  ;;  %v3222_v17 = vshll.u32 %v2457_v8, 16  ;;  %v3223_v18 = vshrl.u32 %v2457_v8, 16  ;;  %v3220_v19 = vshll.u32 %v2460_v9, 16 }
  0x17   : > { %v2305_v20 = vld [vmem:[%s2433_s28 + $0x28] sm:$0xff]  ;;  %v453_v22 = vrot.slane %v451_v10, 1  ;;  %v2485_v23 = vrot.slane %v475_v11, 1  ;;  %v485_v24 = vrot.slane %v483_v13, 1  ;;  %v412_v25 = vshrl.u32 %v2467_v14, 16  ;;  %v2521_v41 = vld [vmem:[%s2438_s5 + $0x30] sm:$0xff] }
  0x18   : > { %v2309_v26 = vld [vmem:[%s2433_s28 + $0x48] sm:$0xff]  ;;  %2313 = vmatpush.bf16.msra.mxu1 %v2302_v5  ;;  %2314 = vmatpush.bf16.msra.mxu2 %v2302_v5  ;;  %v449_v27 = vor.u32 %v447_v7, %v2474_v16  ;;  %v2496_v28 = vrot.slane %v3222_v17, 1  ;;  %v517_v29 = vrot.slane %v3220_v19, 1  ;;  %v414_v30 = vshll.u32 %v2467_v14, 16  ;;  %v2525_v42 = vld [vmem:[%s2438_s5 + $0x50] sm:$0xff]  ;;  %v2304_v43 = vld [vmem:[%s2433_s28 + $0x20] sm:$0xff] }
  0x19   : > { %v2301_v31 = vld [vmem:[%s2433_s28 + $0x8] sm:$0xff]  ;;  %2315 = vmatpush.bf16.msra.mxu3 %v2302_v5  ;;  %611 = vmatpush.bf16.msra.mxu0 %v2302_v5  ;;  %v481_v32 = vor.u32 %v479_v12, %v2485_v23  ;;  %v419_v33 = vshll.u32 %v2470_v15, 16  ;;  %v2530_v45 = vld [vmem:[%s2438_s5 + $0x70] sm:$0xff]  ;;  %v2300_v47 = vld [vmem:[%s2433_s28] sm:$0xff]  ;;  %v455_v49 = vshrl.u32 %v2445_v2, 16  ;;  %v459_v50 = vshll.u32 %v2521_v41, 16 }
  0x1a   : > { %v454_v34 = vsel %vm410_vm0, %v449_v27, %v453_v22  ;;  %v513_v35 = vor.u32 %v3223_v18, %v2496_v28  ;;  %v416_v36 = vrot.slane %v414_v30, 1  ;;  %v2306_v46 = vld [vmem:[%s2433_s28 + $0x30] sm:$0xff]  ;;  %v2308_v48 = vld [vmem:[%s2433_s28 + $0x40] sm:$0xff]  ;;  %v487_v52 = vshrl.u32 %v2451_v4, 16  ;;  %v2573_v27 = vld [vmem:[%s2438_s5 + $0x38] sm:$0xff] }
  0x1b   : > { %2162 = vmatmul.msk.bf16.vlgmr.msra.gmra.mxu1 %vm555_vm1, %v454_v34  ;;  %v486_v37 = vsel %vm410_vm0, %v481_v32, %v485_v24  ;;  %v421_v38 = vrot.slane %v419_v33, 1  ;;  %v2539_v51 = vld [vmem:[%s2438_s5 + $0x10] sm:$0xff]  ;;  %v491_v53 = vshll.u32 %v2525_v42, 16  ;;  %v3221_v54 = vshrl.u32 %v2460_v9, 16 }
  0x1c   : > { %932 = vmatpush.bf16.msrb.mxu2 %v2305_v20  ;;  %v518_v39 = vsel %vm410_vm0, %v513_v35, %v517_v29  ;;  %v417_v40 = vor.u32 %v416_v36, %v412_v25  ;;  %743 = vmatpush.bf16.msrb.mxu1 %v2301_v31  ;;  %v3218_v55 = vshll.u32 %v2530_v45, 16  ;;  %v457_v56 = vor.u32 %v455_v49, %v453_v22  ;;  %v2580_v31 = vld [vmem:[%s2438_s5 + $0x78] sm:$0xff] }
  0x1d   : > { %1188 = vmatpush.bf16.msrb.mxu3 %v2307_v21  ;;  %1408 = vmatpush.bf16.msrb.mxu0 %v2309_v26  ;;  %v461_v57 = vrot.slane %v459_v50, 1  ;;  %v423_v58 = vshrl.u32 %v2470_v15, 16  ;;  %v427_v59 = vshll.u32 %v2539_v51, 16  ;;  %v489_v60 = vor.u32 %v487_v52, %v485_v24  ;;  %v2586_v35 = vld [vmem:[%s2438_s5 + $0x18] sm:$0xff] }
  0x1e   : > { %2166 = vmatmul.msk.bf16.vlgmr.msra.gmra.mxu2 %vm555_vm1, %v486_v37  ;;  %2170 = vmatmul.msk.bf16.vlgmr.msra.gmra.mxu3 %vm555_vm1, %v518_v39  ;;  %v422_v44 = vsel %vm410_vm0, %v417_v40, %v421_v38  ;;  %v493_v61 = vrot.slane %v491_v53, 1  ;;  %v521_v62 = vor.u32 %v3221_v54, %v517_v29  ;;  %v525_v63 = vrot.slane %v3218_v55, 1  ;;  %v2577_v29 = vld [vmem:[%s2438_s5 + $0x58] sm:$0xff] }
  0x1f   : > { %2158 = vmatmul.msk.bf16.vlgmr.msra.gmra.mxu0 %vm555_vm1, %v422_v44  ;;  %v462_v0 = vsel %vm410_vm0, %v457_v56, %v461_v57  ;;  %v425_v5 = vor.u32 %v423_v58, %v421_v38  ;;  %v429_v20 = vrot.slane %v427_v59, 1  ;;  %v3228_v24 = vmov 0  }
  0x20   : > { %933 = vmatpush.bf16.msrb.mxu2 %v2304_v43  ;;  %744 = vmatpush.bf16.msrb.mxu1 %v2300_v47  ;;  %v494_v21 = vsel %vm410_vm0, %v489_v60, %v493_v61  ;;  %v526_v22 = vsel %vm410_vm0, %v521_v62, %v525_v63  ;;  %v463_v32 = vshrl.u32 %v2521_v41, 16  ;;  %v467_v34 = vshll.u32 %v2573_v27, 16 }
  0x21   : > { %1189 = vmatpush.bf16.msrb.mxu3 %v2306_v46  ;;  %1409 = vmatpush.bf16.msrb.mxu0 %v2308_v48  ;;  %v430_v26 = vsel %vm410_vm0, %v425_v5, %v429_v20  ;;  %v495_v36 = vshrl.u32 %v2525_v42, 16  ;;  %v3225_v37 = vshll.u32 %v2577_v29, 16  ;;  %v3219_v38 = vshrl.u32 %v2530_v45, 16 }
  0x22   : > { %2342 = vset.pattern.permute.xlu0 %v3228_v24  ;;  %2343 = vset.pattern.permute.xlu1 %v3228_v24  ;;  %v3216_v39 = vshll.u32 %v2580_v31, 16  ;;  %v465_v40 = vor.u32 %v463_v32, %v461_v57  ;;  %v469_v43 = vrot.slane %v467_v34, 1  ;;  %v431_v44 = vshrl.u32 %v2539_v51, 16 }
  0x23   : > { %2344 = vset.pattern.permute.xlu2 %v3228_v24  ;;  %v435_v46 = vshll.u32 %v2586_v35, 16  ;;  %v497_v47 = vor.u32 %v495_v36, %v493_v61  ;;  %v501_v48 = vrot.slane %v3225_v37, 1  ;;  %v529_v56 = vor.u32 %v3219_v38, %v525_v63 }
  0x24   : > { %v533_v57 = vrot.slane %v3216_v39, 1  ;;  %v470_v60 = vsel %vm410_vm0, %v465_v40, %v469_v43  ;;  %v433_v62 = vor.u32 %v431_v44, %v429_v20  ;;  %v471_v20 = vshrl.u32 %v2573_v27, 16 }
  0x25   : > { %v502_v5 = vsel %vm410_vm0, %v497_v47, %v501_v48  ;;  %v439_v40 = vshrl.u32 %v2586_v35, 16 }
  0x26   : > { %v534_v61 = vsel %vm410_vm0, %v529_v56, %v533_v57 }
  0x2b   : > { %2163 = vmatmul.msk.bf16.gmra.mxu1 %vm555_vm1, %v462_v0  ;;  %v437_v0 = vrot.slane %v435_v46, 1 }
  0x2d   : > { %v438_v63 = vsel %vm410_vm0, %v433_v62, %v437_v0 }
  0x2e   : > { %2167 = vmatmul.msk.bf16.gmra.mxu2 %vm555_vm1, %v494_v21  ;;  %2171 = vmatmul.msk.bf16.gmra.mxu3 %vm555_vm1, %v526_v22  ;;  %v3226_v21 = vshrl.u32 %v2577_v29, 16  ;;  %v3217_v22 = vshrl.u32 %v2580_v31, 16 }
  0x2f   : > { %2159 = vmatmul.msk.bf16.gmra.mxu0 %vm555_vm1, %v430_v26  ;;  %v473_v26 = vor.u32 %v471_v20, %v469_v43  ;;  %v441_v43 = vor.u32 %v439_v40, %v437_v0 }
  0x30   : > { %v505_v47 = vor.u32 %v3226_v21, %v501_v48  ;;  %v537_v56 = vor.u32 %v3217_v22, %v533_v57  ;;  %v2656_v48 = vld [vmem:[%s2649_s10] sm:$0xff] }
  0x31   : > { %v478_v62 = vsel %vm410_vm0, %v473_v26, %v2485_v23  ;;  %v446_v23 = vsel %vm410_vm0, %v441_v43, %v2474_v16  ;;  %v1542_v0 = vperm.slane %v2656_v48, 0  ;;  %v1054_v16 = vrot.slane %v414_v30, 2 }
  0x32   : > { %v833_v43 = vrot.slane %v2467_v14, 1  ;;  %v1309_v30 = vrot.slane %v2467_v14, 2 }
  0x3b   : > { %2164 = vmatmul.msk.bf16.gmra.mxu1 %vm555_vm1, %v470_v60  ;;  %v2632_v60 = vrot.slane %v3228_v24, 1 }
  0x3e   : > { %2168 = vmatmul.msk.bf16.gmra.mxu2 %vm555_vm1, %v502_v5  ;;  %2172 = vmatmul.msk.bf16.gmra.mxu3 %vm555_vm1, %v534_v61  ;;  %v510_v5 = vsel %vm410_vm0, %v505_v47, %v2496_v28  ;;  %v542_v61 = vsel %vm410_vm0, %v537_v56, %v2632_v60  ;;  %v1523_v28 = vlaneseq  ;;  %v1056_v47 = vrot.slane %v423_v58, 1 }
  0x3f   : > { %2160 = vmatmul.msk.bf16.gmra.mxu0 %vm555_vm1, %v438_v63  ;;  %v1053_v63 = vrot.slane %v412_v25, 1  ;;  %v1057_v56 = vrot.slane %v419_v33, 2  ;;  %v834_v25 = vrot.slane %v2470_v15, 1  ;;  %v1310_v58 = vrot.slane %v2470_v15, 2 }
  0x40   : > { %v2659_v57 = vshrl.u32 %v1523_v28, 7 }
  0x41   : > { %v835_v33 = vsel %vm832_vm4, %v833_v43, %v834_v25 }
  0x42   : > { %vm1558_vm2 = vcmp.lt.s32.totalorder %v2659_v57, %v1542_v0  ;;  %v2666_v26 = vadd.s32 8, %v2659_v57 }
  0x44   : > { %vm1559_vm3 = vcmp.lt.s32.totalorder %v2666_v26, %v1542_v0  ;;  %v1311_v0 = vsel %vm1308_vm6, %v1309_v30, %v1310_v58 }
  0x4b   : > { %2165 = vmatmul.msk.bf16.gmra.mxu1 %vm555_vm1, %v478_v62  ;;  %v1590_v62 = vsel %vm1558_vm2, 1, %v3228_v24 }
  0x4c   : > { %1623 = vperm.xlu0 %2342, %v1590_v62   ;;  %v836_v62 = vrot.slane %v2539_v51, 1 }
  0x4e   : > { %2169 = vmatmul.msk.bf16.gmra.mxu2 %vm555_vm1, %v510_v5  ;;  %2173 = vmatmul.msk.bf16.gmra.mxu3 %vm555_vm1, %v542_v61  ;;  %v1055_v5 = vor.u32 %v1054_v16, %v1053_v63  ;;  %v1058_v61 = vor.u32 %v1057_v56, %v1056_v47  ;;  %v1528_v63 = vrot.slane %v2656_v48, 1  ;;  %v1060_v47 = vrot.slane %v431_v44, 1 }
  0x4f   : > { %2161 = vmatmul.msk.bf16.gmra.mxu0 %vm555_vm1, %v446_v23  ;;  %v1591_v23 = vsel %vm1559_vm3, 1, %v3228_v24  ;;  %v1064_v44 = vrot.slane %v439_v40, 1 }
  0x50   : > { %v1059_v28 = vsel %vm1052_vm5, %v1055_v5, %v1058_v61  ;;  %v1543_v16 = vperm.slane %v1528_v63, 0  ;;  %v1312_v5 = vrot.slane %v2539_v51, 2 }
  0x52   : > { %vm1560_vm7 = vcmp.lt.s32.totalorder %v2659_v57, %v1543_v16  ;;  %vm1561_vm8 = vcmp.lt.s32.totalorder %v2666_v26, %v1543_v16  ;;  %v1068_v16 = vrot.slane %v447_v7, 1 }
  0x53   : > { %v1592_v56 = vsel %vm1560_vm7, 1, %v3228_v24  ;;  %v1593_v30 = vsel %vm1561_vm8, 1, %v3228_v24 }
  0x54   : > { %1626 = vperm.xlu0 %2342, %v1591_v23   ;;  %1629 = vperm.xlu1 %2343, %v1592_v56   ;;  %v837_v23 = vsel %vm832_vm4, %v834_v25, %v836_v62  ;;  %v1065_v25 = vrot.slane %v435_v46, 2  ;;  %v1530_v46 = vrot.slane %v2656_v48, 3  ;;  %v1529_v56 = vrot.slane %v2656_v48, 2 }
  0x56   : > { %v1545_v40 = vperm.slane %v1530_v46, 0 }
  0x58   : > { %vm1564_vm9 = vcmp.lt.s32.totalorder %v2659_v57, %v1545_v40  ;;  %vm1565_vm10 = vcmp.lt.s32.totalorder %v2666_v26, %v1545_v40 }
  0x59   : > { %v1597_v7 = vsel %vm1565_vm10, 1, %v3228_v24 }
  0x5b   : > { %2182 = vmatmul.msk.bf16.vlgmr.msrb.gmra.mxu1 %vm555_vm1, %v2467_v14  ;;  %v1061_v14 = vrot.slane %v427_v59, 2  ;;  %v1313_v59 = vsel %vm1308_vm6, %v1310_v58, %v1312_v5 }
  0x5c   : > { %1632 = vperm.xlu1 %2343, %v1593_v30  }
  0x5d   : > { %v1062_v43 = vor.u32 %v1061_v14, %v1060_v47  ;;  %v1069_v47 = vrot.slane %v443_v6, 2  ;;  %v840_v14 = vrot.slane %v2442_v1, 1 }
  0x5e   : > { %2210 = vmatmul.msk.bf16.vlgmr.msrb.gmra.mxu2 %vm555_vm1, %v835_v33  ;;  %2238 = vmatmul.msk.bf16.vlgmr.msrb.gmra.mxu3 %vm555_vm1, %v1059_v28  ;;  %v1066_v28 = vor.u32 %v1065_v25, %v1064_v44  ;;  %v1072_v44 = vrot.slane %v455_v49, 1  ;;  %v1073_v25 = vrot.slane %v451_v10, 2 }
  0x5f   : > { %2266 = vmatmul.msk.bf16.vlgmr.msrb.gmra.mxu0 %vm555_vm1, %v1311_v0  ;;  %v1063_v33 = vsel %vm1052_vm5, %v1058_v61, %v1062_v43  ;;  %v838_v61 = vrot.slane %v2586_v35, 1 }
  0x60   : > { %v1067_v63 = vsel %vm1052_vm5, %v1062_v43, %v1066_v28  ;;  %v1544_v43 = vperm.slane %v1529_v56, 0 }
  0x61   : > { %v839_v0 = vsel %vm832_vm4, %v836_v62, %v838_v61  ;;  %v1070_v62 = vor.u32 %v1069_v47, %v1068_v16  ;;  %v841_v30 = vsel %vm832_vm4, %v838_v61, %v840_v14  ;;  %v1531_v61 = vrot.slane %v2656_v48, 4 }
  0x62   : > { %vm1562_vm11 = vcmp.lt.s32.totalorder %v2659_v57, %v1544_v43  ;;  %vm1563_vm12 = vcmp.lt.s32.totalorder %v2666_v26, %v1544_v43  ;;  %v1532_v16 = vrot.slane %v2656_v48, 5 }
  0x63   : > { %v1071_v6 = vsel %vm1052_vm5, %v1066_v28, %v1070_v62  ;;  %v1074_v28 = vor.u32 %v1073_v25, %v1072_v44 }
  0x64   : > { %1644 = vperm.xlu1 %2343, %v1597_v7  }
  0x65   : > { %v1075_v49 = vsel %vm1052_vm5, %v1070_v62, %v1074_v28  ;;  %v1077_v62 = vrot.slane %v459_v50, 2 }
  0x6b   : > { %2183 = vmatmul.msk.bf16.gmra.mxu1 %vm555_vm1, %v2470_v15  ;;  %v1314_v15 = vrot.slane %v2586_v35, 2 }
  0x6d   : > { %v1315_v58 = vsel %vm1308_vm6, %v1312_v5, %v1314_v15  ;;  %v1316_v5 = vrot.slane %v2442_v1, 2 }
  0x6e   : > { %2211 = vmatmul.msk.bf16.gmra.mxu2 %vm555_vm1, %v837_v23  ;;  %2239 = vmatmul.msk.bf16.gmra.mxu3 %vm555_vm1, %v1063_v33  ;;  %v1594_v23 = vsel %vm1562_vm11, 1, %v3228_v24 }
  0x6f   : > { %2267 = vmatmul.msk.bf16.gmra.mxu0 %vm555_vm1, %v1313_v59  ;;  %1635 = vperm.xlu2 %2344, %v1594_v23   ;;  %v1317_v33 = vsel %vm1308_vm6, %v1314_v15, %v1316_v5  ;;  %v1595_v59 = vsel %vm1563_vm12, 1, %v3228_v24  ;;  %v1546_v15 = vperm.slane %v1531_v61, 0 }
  0x71   : > { %vm1567_vm13 = vcmp.lt.s32.totalorder %v2666_v26, %v1546_v15  ;;  %vm1566_vm15 = vcmp.lt.s32.totalorder %v2659_v57, %v1546_v15  ;;  %v1533_v15 = vrot.slane %v2656_v48, 6 }
  0x72   : > { %v1599_v46 = vsel %vm1567_vm13, 1, %v3228_v24 }
  0x77   : > { %1638 = vperm.xlu2 %2344, %v1595_v59   ;;  %v1320_v59 = vrot.slane %v2521_v41, 2 }
  0x7b   : > { %2184 = vmatmul.msk.bf16.gmra.mxu1 %vm555_vm1, %v2539_v51  ;;  %v1596_v51 = vsel %vm1564_vm9, 1, %v3228_v24 }
  0x7c   : > { %1641 = vperm.xlu0 %2342, %v1596_v51   ;;  %v1547_v51 = vperm.slane %v1532_v16, 0  ;;  %v846_v16 = vrot.slane %v2573_v27, 1 }
  0x7e   : > { %2212 = vmatmul.msk.bf16.gmra.mxu2 %vm555_vm1, %v839_v0  ;;  %2240 = vmatmul.msk.bf16.gmra.mxu3 %vm555_vm1, %v1067_v63  ;;  %v1318_v63 = vrot.slane %v2445_v2, 2  ;;  %vm1568_vm14 = vcmp.lt.s32.totalorder %v2659_v57, %v1547_v51  ;;  %vm1569_vm3 = vcmp.lt.s32.totalorder %v2666_v26, %v1547_v51 }
  0x7f   : > { %2268 = vmatmul.msk.bf16.gmra.mxu0 %vm555_vm1, %v1315_v58  ;;  %v1600_v43 = vsel %vm1568_vm14, 1, %v3228_v24 }
  0x80   : > { %v1319_v40 = vsel %vm1308_vm6, %v1316_v5, %v1318_v63  ;;  %1653 = vperm.xlu1 %2343, %v1600_v43   ;;  %v1321_v61 = vsel %vm1308_vm6, %v1318_v63, %v1320_v59  ;;  %v1081_v63 = vrot.slane %v467_v34, 2 }
  0x84   : > { %1650 = vperm.xlu0 %2342, %v1599_v46  }
  0x8b   : > { %2185 = vmatmul.msk.bf16.gmra.mxu1 %vm555_vm1, %v2586_v35  ;;  %v842_v35 = vrot.slane %v2445_v2, 1 }
  0x8d   : > { %v843_v58 = vsel %vm832_vm4, %v840_v14, %v842_v35 }
  0x8e   : > { %2213 = vmatmul.msk.bf16.gmra.mxu2 %vm555_vm1, %v841_v30  ;;  %2241 = vmatmul.msk.bf16.gmra.mxu3 %vm555_vm1, %v1071_v6  ;;  %v844_v30 = vrot.slane %v2521_v41, 1 }
  0x8f   : > { %2269 = vmatmul.msk.bf16.gmra.mxu0 %vm555_vm1, %v1317_v33 }
  0x90   : > { %v845_v50 = vsel %vm832_vm4, %v842_v35, %v844_v30 }
  0x98   : > { %v2752_v0 = vpop.f32.mrf.mxu1 }
  0x9b   : > { %2186 = vmatmul.msk.bf16.gmra.mxu1 %vm555_vm1, %v2442_v1  ;;  %v1076_v1 = vrot.slane %v463_v32, 1  ;;  %v1598_v32 = vsel %vm1566_vm15, 1, %v3228_v24 }
  0x9c   : > { %v2761_v10 = vpop.f32.mrf.mxu0  ;;  %1647 = vperm.xlu2 %2344, %v1598_v32   ;;  %v1322_v32 = vrot.slane %v2573_v27, 2 }
  0x9d   : > { %v1078_v7 = vor.u32 %v1077_v62, %v1076_v1 }
  0x9e   : > { %2214 = vmatmul.msk.bf16.gmra.mxu2 %vm555_vm1, %v843_v58  ;;  %2242 = vmatmul.msk.bf16.gmra.mxu3 %vm555_vm1, %v1075_v49  ;;  %v1548_v58 = vperm.slane %v1533_v15, 0  ;;  %v1323_v15 = vsel %vm1308_vm6, %v1320_v59, %v1322_v32  ;;  %v1601_v59 = vsel %vm1569_vm3, 1, %v3228_v24 }
  0x9f   : > { %2270 = vmatmul.msk.bf16.gmra.mxu0 %vm555_vm1, %v1319_v40  ;;  %v1079_v44 = vsel %vm1052_vm5, %v1074_v28, %v1078_v7 }
  0xa0   : > { %v2772_v56 = vpop.f32.mrf.mxu1  ;;  %vm1570_vm0 = vcmp.lt.s32.totalorder %v2659_v57, %v1548_v58  ;;  %vm1571_vm2 = vcmp.lt.s32.totalorder %v2666_v26, %v1548_v58 }
  0xa1   : > { %v2768_v47 = vpop.f32.mrf.mxu2  ;;  %v2770_v14 = vpop.f32.mrf.mxu3  ;;  %v1602_v46 = vsel %vm1570_vm0, 1, %v3228_v24 }
  0xa2   : > { %1659 = vperm.xlu0 %2342, %v1602_v46   ;;  %v848_v46 = vrot.slane %v2448_v3, 1 }
  0xa4   : > { %v2780_v5 = vpop.f32.mrf.mxu0  ;;  %1656 = vperm.xlu2 %2344, %v1601_v59   ;;  %v849_v39 = vsel %vm832_vm4, %v846_v16, %v848_v46 }
  0xa8   : > { %v2787_v33 = vpop.f32.mrf.mxu1 }
  0xa9   : > { %v2783_v6 = vpop.f32.mrf.mxu2  ;;  %v2785_v23 = vpop.f32.mrf.mxu3 }
  0xab   : > { %2187 = vmatmul.msk.bf16.gmra.mxu1 %vm555_vm1, %v2445_v2  ;;  %v1080_v2 = vrot.slane %v471_v20, 1  ;;  %v847_v20 = vsel %vm832_vm4, %v844_v30, %v846_v16 }
  0xac   : > { %v2796_v25 = vpop.f32.mrf.mxu0 }
  0xad   : > { %v1082_v1 = vor.u32 %v1081_v63, %v1080_v2  ;;  %v1085_v2 = vrot.slane %v475_v11, 2  ;;  %v1324_v11 = vrot.slane %v2448_v3, 2 }
  0xae   : > { %2215 = vmatmul.msk.bf16.gmra.mxu2 %vm555_vm1, %v845_v50  ;;  %2243 = vmatmul.msk.bf16.gmra.mxu3 %vm555_vm1, %v1079_v44  ;;  %v1603_v44 = vsel %vm1571_vm2, 1, %v3228_v24 }
  0xaf   : > { %2271 = vmatmul.msk.bf16.gmra.mxu0 %vm555_vm1, %v1321_v61  ;;  %v1083_v34 = vsel %vm1052_vm5, %v1078_v7, %v1082_v1  ;;  %1662 = vperm.xlu1 %2343, %v1603_v44  }
  0xb0   : > { %v2807_v49 = vpop.f32.mrf.mxu1 }
  0xb1   : > { %v2803_v35 = vpop.f32.mrf.mxu2  ;;  %v2805_v28 = vpop.f32.mrf.mxu3 }
  0xb4   : > { %v2815_v40 = vpop.f32.mrf.mxu0 }
  0xb8   : > { %v2822_v50 = vpop.f32.mrf.mxu1 }
  0xb9   : > { %v2818_v62 = vpop.f32.mrf.mxu2  ;;  %v2820_v43 = vpop.f32.mrf.mxu3 }
  0xbb   : > { %2188 = vmatmul.msk.bf16.gmra.mxu1 %vm555_vm1, %v2521_v41  ;;  %v1084_v41 = vrot.slane %v479_v12, 1 }
  0xbc   : > { %v2831_v61 = vpop.f32.mrf.mxu0 }
  0xbe   : > { %2216 = vmatmul.msk.bf16.gmra.mxu2 %vm555_vm1, %v847_v20  ;;  %2244 = vmatmul.msk.bf16.gmra.mxu3 %vm555_vm1, %v1083_v34  ;;  %v1534_v20 = vrot.slane %v2656_v48, 7  ;;  %v1086_v34 = vor.u32 %v1085_v2, %v1084_v41  ;;  %v1325_v41 = vsel %vm1308_vm6, %v1322_v32, %v1324_v11  ;;  %v2872_v2 = vld [vmem:[%s2649_s10 + $0x8] sm:$0xff] }
  0xbf   : > { %2272 = vmatmul.msk.bf16.gmra.mxu0 %vm555_vm1, %v1323_v15  ;;  %v1535_v55 = vrot.slane %v2872_v2, 1 }
  0xc0   : > { %v2841_v7 = vpop.f32.mrf.mxu1  ;;  %v1549_v51 = vperm.slane %v1534_v20, 0  ;;  %v1087_v59 = vsel %vm1052_vm5, %v1082_v1, %v1086_v34  ;;  %v3224_v1 = vperm.slane %v2872_v2, 0 }
  0xc1   : > { %v2837_v30 = vpop.f32.mrf.mxu2  ;;  %v2839_v58 = vpop.f32.mrf.mxu3  ;;  %v1551_v54 = vperm.slane %v1535_v55, 0 }
  0xc2   : > { %vm1573_vm7 = vcmp.lt.s32.totalorder %v2666_v26, %v1549_v51  ;;  %vm1574_vm8 = vcmp.lt.s32.totalorder %v2659_v57, %v3224_v1  ;;  %vm1572_vm10 = vcmp.lt.s32.totalorder %v2659_v57, %v1549_v51 }
  0xc3   : > { %v1605_v22 = vsel %vm1573_vm7, 1, %v3228_v24  ;;  %v1606_v32 = vsel %vm1574_vm8, 1, %v3228_v24  ;;  %vm1576_vm9 = vcmp.lt.s32.totalorder %v2659_v57, %v1551_v54  ;;  %vm1577_vm11 = vcmp.lt.s32.totalorder %v2666_v26, %v1551_v54  ;;  %v1624_v54 = vpop.permute.xlu0 %1623 }
  0xc4   : > { %v2849_v63 = vpop.f32.mrf.mxu0  ;;  %1668 = vperm.xlu0 %2342, %v1605_v22   ;;  %v1089_v22 = vrot.slane %v483_v13, 2  ;;  %1671 = vperm.xlu1 %2343, %v1606_v32   ;;  %v3227_v13 = vrot.slane %v2451_v4, 2  ;;  %v1604_v55 = vsel %vm1572_vm10, 1, %v3228_v24  ;;  %v1609_v32 = vsel %vm1577_vm11, 1, %v3228_v24 }
  0xc5   : > { %1665 = vperm.xlu2 %2344, %v1604_v55   ;;  %vm1718_vm0 = vcmp.eq.s32.totalorder %v1624_v54, 1  ;;  %v1540_v54 = vrot.slane %v2872_v2, 6 }
  0xc8   : > { %v2857_v12 = vpop.f32.mrf.mxu1 }
  0xc9   : > { %v2853_v44 = vpop.f32.mrf.mxu2  ;;  %v2855_v15 = vpop.f32.mrf.mxu3 }
  0xcb   : > { %2189 = vmatmul.msk.bf16.gmra.mxu1 %vm555_vm1, %v2573_v27 }
  0xcc   : > { %v2866_v48 = vpop.f32.mrf.mxu0  ;;  %1680 = vperm.xlu1 %2343, %v1609_v32   ;;  %v1093_v32 = vrot.slane %v491_v53, 2 }
  0xce   : > { %2217 = vmatmul.msk.bf16.gmra.mxu2 %vm555_vm1, %v849_v39  ;;  %2245 = vmatmul.msk.bf16.gmra.mxu3 %vm555_vm1, %v1087_v59  ;;  %v1088_v39 = vrot.slane %v487_v52, 1 }
  0xcf   : > { %2273 = vmatmul.msk.bf16.gmra.mxu0 %vm555_vm1, %v1325_v41  ;;  %v850_v41 = vrot.slane %v2451_v4, 1 }
  0xd0   : > { %v2880_v27 = vpop.f32.mrf.mxu1  ;;  %v1090_v38 = vor.u32 %v1089_v22, %v1088_v39  ;;  %v1608_v22 = vsel %vm1576_vm9, 1, %v3228_v24 }
  0xd1   : > { %v2875_v16 = vpop.f32.mrf.mxu2  ;;  %v2878_v20 = vpop.f32.mrf.mxu3  ;;  %v851_v52 = vsel %vm832_vm4, %v848_v46, %v850_v41  ;;  %1677 = vperm.xlu0 %2342, %v1608_v22  }
  0xd2   : > { %3233 = vst [vmem:[#allocation2_spill] sm:$0xff] %v2878_v20  ;;  %v1091_v39 = vsel %vm1052_vm5, %v1086_v34, %v1090_v38  ;;  %v1537_v34 = vrot.slane %v2872_v2, 3  ;;  %v3230_v20 = vrot.slane %v2525_v42, 2 }
  0xd4   : > { %v2890_v59 = vpop.f32.mrf.mxu0  ;;  %v2920_v22 = vperm.slane %v1537_v34, 0 }
  0xd6   : > { %vm1580_vm13 = vcmp.lt.s32.totalorder %v2659_v57, %v2920_v22 }
  0xd8   : > { %v746_v18 = vpop.f32.mrf.mxu1 }
  0xd9   : > { %v2894_v19 = vpop.f32.mrf.mxu2  ;;  %v2896_v17 = vpop.f32.mrf.mxu3  ;;  %v747_v1 = vadd.f32 %v746_v18, %v2761_v10  ;;  %v1327_v18 = vsel %vm1308_vm6, %v1324_v11, %v3227_v13  ;;  %v1536_v10 = vrot.slane %v2872_v2, 2 }
  0xda   : > { %3234 = vst [vmem:[#allocation3_spill] sm:$0xff] %v2896_v17  ;;  %v1627_v13 = vpop.permute.xlu0 %1626 }
  0xdb   : > { %2190 = vmatmul.msk.bf16.gmra.mxu1 %vm555_vm1, %v2448_v3  ;;  %v2918_v51 = vperm.slane %v1536_v10, 0  ;;  %vm1719_vm2 = vcmp.eq.s32.totalorder %v1627_v13, 1  ;;  %v1539_v13 = vrot.slane %v2872_v2, 5 }
  0xdc   : > { %v1411_v46 = vpop.f32.mrf.mxu0 }
  0xdd   : > { %vm1579_vm12 = vcmp.lt.s32.totalorder %v2666_v26, %v2918_v51 }
  0xde   : > { %2218 = vmatmul.msk.bf16.gmra.mxu2 %vm555_vm1, %v851_v52  ;;  %2246 = vmatmul.msk.bf16.gmra.mxu3 %vm555_vm1, %v1091_v39  ;;  %v1092_v39 = vrot.slane %v495_v36, 1  ;;  %v1538_v36 = vrot.slane %v2872_v2, 4 }
  0xdf   : > { %2274 = vmatmul.msk.bf16.gmra.mxu0 %vm555_vm1, %v1327_v18  ;;  %v1611_v18 = vsel %vm1579_vm12, 1, %v3228_v24 }
  0xe0   : > { %v748_v21 = vpop.f32.mrf.mxu1  ;;  %1686 = vperm.xlu0 %2342, %v1611_v18   ;;  %v2935_v34 = vor.u32 %v1093_v32, %v1092_v39  ;;  %v3235_v32 = vmov 0  }
  0xe1   : > { %v935_v3 = vpop.f32.mrf.mxu2  ;;  %v1191_v37 = vpop.f32.mrf.mxu3  ;;  %v749_v11 = vadd.f32 %v748_v21, %v2780_v5  ;;  %v3231_v5 = vrot.slane %v2525_v42, 1 }
  0xe2   : > { %v1015_v52 = vadd.f32 %v935_v3, %v747_v1  ;;  %v1612_v1 = vsel %vm1580_vm13, 1, %v3228_v24  ;;  %vm1578_vm13 = vcmp.lt.s32.totalorder %v2659_v57, %v2918_v51  ;;  %v856_v51 = vrot.slane %v2457_v8, 1 }
  0xe3   : > { %1689 = vperm.xlu1 %2343, %v1612_v1   ;;  %v1630_v1 = vpop.permute.xlu1 %1629 }
  0xe4   : > { %v1271_v55 = vadd.f32 %v1191_v37, %v1015_v52  ;;  %v1413_v21 = vpop.f32.mrf.mxu0  ;;  %v1554_v37 = vperm.slane %v1538_v36, 0  ;;  %vm1720_vm11 = vcmp.eq.s32.totalorder %v1630_v1, 1 }
  0xe6   : > { %v1491_v10 = vadd.f32 %v1411_v46, %v1271_v55  ;;  %v853_v46 = vsel %vm832_vm4, %v850_v41, %v3231_v5  ;;  %vm1582_vm14 = vcmp.lt.s32.totalorder %v2659_v57, %v1554_v37  ;;  %vm1583_vm15 = vcmp.lt.s32.totalorder %v2666_v26, %v1554_v37 }
  0xe7   : > { %v1095_v55 = vsel %vm1052_vm5, %v1090_v38, %v2935_v34  ;;  %v1615_v18 = vsel %vm1583_vm15, 1, %v3235_v32  ;;  %v3232_v5 = vrot.slane %v2577_v29, 2 }
  0xe8   : > { %v751_v53 = vpop.f32.mrf.mxu1  ;;  %v1750_v36 = vsel %vm1718_vm0, %v1491_v10, -1e+30 }
  0xe9   : > { %v937_v3 = vpop.f32.mrf.mxu2  ;;  %v1193_v17 = vpop.f32.mrf.mxu3  ;;  %v752_v24 = vadd.f32 %v751_v53, %v2796_v25  ;;  %v2962_v53 = vperm.slane %v1540_v54, 0 }
  0xea   : > { %v1016_v52 = vadd.f32 %v937_v3, %v749_v11  ;;  %v1614_v11 = vsel %vm1582_vm14, 1, %v3235_v32  ;;  %vm1581_vm14 = vcmp.lt.s32.totalorder %v2666_v26, %v2920_v22  ;;  %v3036_v22 = vld [vmem:[%s271_s24] ss:$0 sm:$0xff] }
  0xeb   : > { %2191 = vmatmul.msk.bf16.gmra.mxu1 %vm555_vm1, %v2451_v4  ;;  %1695 = vperm.xlu0 %2342, %v1614_v11   ;;  %v3237_v11 = vshrl.u32 %v2577_v29, 16  ;;  %vm1586_vm8 = vcmp.lt.s32.totalorder %v2659_v57, %v2962_v53 }
  0xec   : > { %v1272_v39 = vadd.f32 %v1193_v17, %v1016_v52  ;;  %v1416_v25 = vpop.f32.mrf.mxu0  ;;  %v3236_v17 = vrot.slane %v2451_v4, 2  ;;  %1698 = vperm.xlu1 %2343, %v1615_v18   ;;  %v2960_v52 = vperm.slane %v1539_v13, 0  ;;  %v3239_v13 = vperm.slane %v2872_v2, 0 }
  0xed   : > { %v1096_v18 = vrot.slane %v3237_v11, 1  ;;  %v1633_v11 = vpop.permute.xlu1 %1632 }
  0xee   : > { %v1492_v41 = vadd.f32 %v1413_v21, %v1272_v39  ;;  %2219 = vmatmul.msk.bf16.gmra.mxu2 %vm555_vm1, %v853_v46  ;;  %v1329_v38 = vsel %vm1308_vm6, %v3236_v17, %v3230_v20  ;;  %2247 = vmatmul.msk.bf16.gmra.mxu3 %vm555_vm1, %v1095_v55  ;;  %v3238_v17 = vshll.u32 %v2577_v29, 16  ;;  %vm1585_vm3 = vcmp.lt.s32.totalorder %v2666_v26, %v2960_v52 }
  0xef   : > { %2275 = vmatmul.msk.bf16.gmra.mxu0 %vm555_vm1, %v1329_v38  ;;  %v1617_v38 = vsel %vm1585_vm3, 1, %v3235_v32  ;;  %vm1575_vm7 = vcmp.lt.s32.totalorder %v2666_v26, %v3239_v13  ;;  %vm1721_vm12 = vcmp.eq.s32.totalorder %v1633_v11, 1  ;;  %vm1584_vm3 = vcmp.lt.s32.totalorder %v2659_v57, %v2960_v52 }
  0xf0   : > { %v1751_v3 = vsel %vm1719_vm2, %v1492_v41, -1e+30  ;;  %v753_v39 = vpop.f32.mrf.mxu1  ;;  %v1097_v10 = vrot.slane %v3238_v17, 2  ;;  %vm1931_vm2 = vcmask 1041409  }
  0xf1   : > { %v1782_v37 = vmax.f32 %v1750_v36, %v1751_v3  ;;  %v940_v21 = vpop.f32.mrf.mxu2  ;;  %v1196_v46 = vpop.f32.mrf.mxu3  ;;  %v754_v55 = vadd.f32 %v753_v39, %v2815_v40  ;;  %v1618_v40 = vsel %vm1586_vm8, 1, %v3235_v32  ;;  %v854_v3 = vrot.slane %v2577_v29, 1 }
  0xf2   : > { %v1017_v4 = vadd.f32 %v940_v21, %v752_v24  ;;  %v1607_v24 = vsel %vm1575_vm7, 1, %v3235_v32  ;;  %v1541_v21 = vrot.slane %v2872_v2, 7  ;;  %vm1587_vm7 = vcmp.lt.s32.totalorder %v2666_v26, %v2962_v53 }
  0xf3   : > { %1704 = vperm.xlu0 %2342, %v1617_v38   ;;  %1674 = vperm.xlu2 %2344, %v1607_v24  }
  0xf4   : > { %v1273_v41 = vadd.f32 %v1196_v46, %v1017_v4  ;;  %v1418_v36 = vpop.f32.mrf.mxu0  ;;  %1707 = vperm.xlu1 %2343, %v1618_v40   ;;  %v2981_v4 = vor.u32 %v1097_v10, %v1096_v18  ;;  %v1783_v46 = vrot.slane %v1782_v37, 4  ;;  %v1557_v17 = vperm.slane %v1541_v21, 0 }
  0xf5   : > { %v3241_v21 = vrot.slane %v2525_v42, 2 }
  0xf6   : > { %v1493_v54 = vadd.f32 %v1416_v25, %v1273_v41  ;;  %v3240_v41 = vrot.slane %v2525_v42, 1  ;;  %vm1588_vm9 = vcmp.lt.s32.totalorder %v2659_v57, %v1557_v17  ;;  %vm1589_vm10 = vcmp.lt.s32.totalorder %v2666_v26, %v1557_v17 }
  0xf7   : > { %v1620_v18 = vsel %vm1588_vm9, 1, %v3235_v32  ;;  %v1621_v10 = vsel %vm1589_vm10, 1, %v3235_v32  ;;  %vm1934_vm10 = vcmask 1042434  }
  0xf8   : > { %v756_v20 = vpop.f32.mrf.mxu1  ;;  %v855_v24 = vsel %vm832_vm4, %v3240_v41, %v854_v3  ;;  %v1752_v1 = vsel %vm1720_vm11, %v1493_v54, -1e+30  ;;  %v3242_v54 = vshrl.u32 %v2457_v8, 16  ;;  %vm1937_vm11 = vcmask 1043459  }
  0xf9   : > { %v942_v39 = vpop.f32.mrf.mxu2  ;;  %v1198_v38 = vpop.f32.mrf.mxu3  ;;  %v757_v25 = vadd.f32 %v756_v20, %v2831_v61  ;;  %v1784_v61 = vmax.f32 %v1782_v37, %v1783_v46 }
  0xfa   : > { %v1018_v13 = vadd.f32 %v942_v39, %v754_v55  ;;  %v1099_v55 = vsel %vm1052_vm5, %v2935_v34, %v2981_v4  ;;  %v1331_v34 = vsel %vm1308_vm6, %v3241_v21, %v3232_v5  ;;  %v1636_v39 = vpop.permute.xlu2 %1635 }
  0xfb   : > { %2192 = vmatmul.msk.bf16.gmra.mxu1 %vm555_vm1, %v2525_v42  ;;  %1713 = vperm.xlu0 %2342, %v1620_v18   ;;  %v1785_v46 = vrot.slane %v1784_v61, 2  ;;  %v3243_v18 = vshll.u32 %v2457_v8, 16  ;;  %vm1722_vm15 = vcmp.eq.s32.totalorder %v1636_v39, 1 }
  0xfc   : > { %v1274_v2 = vadd.f32 %v1198_v38, %v1018_v13  ;;  %v1421_v20 = vpop.f32.mrf.mxu0  ;;  %1716 = vperm.xlu1 %2343, %v1621_v10  }
  0xfd   : > { %v1101_v10 = vrot.slane %v3243_v18, 2  ;;  %v1332_v18 = vrot.slane %v2457_v8, 2 }
  0xfe   : > { %v1494_v40 = vadd.f32 %v1418_v36, %v1274_v2  ;;  %2220 = vmatmul.msk.bf16.gmra.mxu2 %vm555_vm1, %v855_v24  ;;  %2248 = vmatmul.msk.bf16.gmra.mxu3 %vm555_vm1, %v1099_v55  ;;  %v1610_v24 = vsel %vm1578_vm13, 1, %v3235_v32  ;;  %v1100_v55 = vrot.slane %v3242_v54, 1 }
  0xff   : > { %2276 = vmatmul.msk.bf16.gmra.mxu0 %vm555_vm1, %v1331_v34  ;;  %1683 = vperm.xlu2 %2344, %v1610_v24  }
 0x100   : > { %v1753_v37 = vsel %vm1721_vm12, %v1494_v40, -1e+30  ;;  %v758_v38 = vpop.f32.mrf.mxu1  ;;  %v1786_v40 = vmax.f32 %v1784_v61, %v1785_v46  ;;  %v857_v46 = vsel %vm832_vm4, %v854_v3, %v856_v51 }
 0x101   : > { %v1789_v11 = vmax.f32 %v1752_v1, %v1753_v37  ;;  %v945_v17 = vpop.f32.mrf.mxu2  ;;  %v1201_v13 = vpop.f32.mrf.mxu3  ;;  %v759_v41 = vadd.f32 %v758_v38, %v2849_v63  ;;  %v3016_v37 = vor.u32 %v1101_v10, %v1100_v55 }
 0x102   : > { %v1019_v36 = vadd.f32 %v945_v17, %v757_v25  ;;  %v1787_v63 = vrot.slane %v1786_v40, 1 }
 0x103   : > { %v1790_v42 = vrot.slane %v1789_v11, 4 }
 0x104   : > { %v1275_v2 = vadd.f32 %v1201_v13, %v1019_v36  ;;  %v1423_v34 = vpop.f32.mrf.mxu0  ;;  %v1639_v13 = vpop.permute.xlu2 %1638 }
 0x105   : > { %v1791_v25 = vmax.f32 %v1789_v11, %v1790_v42  ;;  %v1613_v11 = vsel %vm1581_vm14, 1, %v3235_v32  ;;  %vm1723_vm0 = vcmp.eq.s32.totalorder %v1639_v13, 1 }
 0x106   : > { %v1495_v21 = vadd.f32 %v1421_v20, %v1275_v2 }
 0x107   : > { %v1792_v1 = vrot.slane %v1791_v25, 2  ;;  %1692 = vperm.xlu2 %2344, %v1613_v11   ;;  %v1616_v11 = vsel %vm1584_vm3, 1, %v3235_v32 }
 0x108   : > { %v761_v5 = vpop.f32.mrf.mxu1  ;;  %v1754_v39 = vsel %vm1722_vm15, %v1495_v21, -1e+30  ;;  %v3245_v21 = vshrl.u32 %v2460_v9, 16 }
 0x109   : > { %v1793_v17 = vmax.f32 %v1791_v25, %v1792_v1  ;;  %v947_v36 = vpop.f32.mrf.mxu2  ;;  %v1203_v54 = vpop.f32.mrf.mxu3  ;;  %v762_v20 = vadd.f32 %v761_v5, %v2866_v48  ;;  %v1788_v48 = vmax.f32 %v1786_v40, %v1787_v63 }
 0x10a   : > { %v1020_v38 = vadd.f32 %v947_v36, %v759_v41  ;;  %v1103_v41 = vsel %vm1052_vm5, %v2981_v4, %v3016_v37  ;;  %v3244_v4 = vrot.slane %v2577_v29, 2 }
 0x10b   : > { %v1794_v61 = vrot.slane %v1793_v17, 1  ;;  %2193 = vmatmul.msk.bf16.gmra.mxu1 %vm555_vm1, %v2577_v29  ;;  %v1898_v40 = vadd.f32 %v3036_v22, %v1788_v48 }
 0x10c   : > { %v1276_v42 = vadd.f32 %v1203_v54, %v1020_v38  ;;  %v1426_v3 = vpop.f32.mrf.mxu0  ;;  %v1333_v2 = vsel %vm1308_vm6, %v3244_v4, %v1332_v18  ;;  %v1104_v54 = vrot.slane %v3245_v21, 1 }
 0x10d   : > { %v1795_v5 = vmax.f32 %v1793_v17, %v1794_v61  ;;  %v3246_v61 = vshll.u32 %v2460_v9, 16  ;;  %v1645_v9 = vpop.permute.xlu1 %1644 }
 0x10e   : > { %v1496_v24 = vadd.f32 %v1423_v34, %v1276_v42  ;;  %2221 = vmatmul.msk.bf16.gmra.mxu2 %vm555_vm1, %v857_v46  ;;  %2249 = vmatmul.msk.bf16.gmra.mxu3 %vm555_vm1, %v1103_v41  ;;  %vm1725_vm9 = vcmp.eq.s32.totalorder %v1645_v9, 1 }
 0x10f   : > { %v1899_v55 = vadd.f32 %v3036_v22, %v1795_v5  ;;  %2277 = vmatmul.msk.bf16.gmra.mxu0 %vm555_vm1, %v1333_v2  ;;  %v1105_v46 = vrot.slane %v3246_v61, 2  ;;  %1701 = vperm.xlu2 %2344, %v1616_v11   ;;  %v3059_v5 = vld [vmem:[%s2438_s5 + $0x68] sm:$0xff] }
 0x110   : > { %v1755_v10 = vsel %vm1723_vm0, %v1496_v24, -1e+30  ;;  %v763_v29 = vpop.f32.mrf.mxu1  ;;  %v858_v57 = vrot.slane %v3059_v5, 1  ;;  %v1642_v24 = vpop.permute.xlu0 %1641 }
 0x111   : > { %v1930_v25 = vrot.slane %v1899_v55, 7  ;;  %v1796_v1 = vmax.f32 %v1754_v39, %v1755_v10  ;;  %v950_v34 = vpop.f32.mrf.mxu2  ;;  %v1206_v17 = vpop.f32.mrf.mxu3  ;;  %v764_v52 = vadd.f32 %v763_v29, %v2890_v59  ;;  %v1106_v4 = vor.u32 %v1105_v46, %v1104_v54  ;;  %v2347_v29 = vld [vmem:[%s2438_s5 + $0x60] sm:$0xff] }
 0x112   : > { %v1021_v63 = vadd.f32 %v950_v34, %v762_v20  ;;  %v859_v59 = vsel %vm832_vm4, %v856_v51, %v858_v57  ;;  %vm1724_vm8 = vcmp.eq.s32.totalorder %v1642_v24, 1 }
 0x113   : > { %v1932_v36 = vsel %vm1931_vm2, %v1930_v25, %v1898_v40  ;;  %v1797_v13 = vrot.slane %v1796_v1, 4 }
 0x114   : > { %v1277_v38 = vadd.f32 %v1206_v17, %v1021_v63  ;;  %v1428_v41 = vpop.f32.mrf.mxu0  ;;  %v1107_v63 = vsel %vm1052_vm5, %v3016_v37, %v1106_v4 }
 0x115   : > { %v1798_v42 = vmax.f32 %v1796_v1, %v1797_v13  ;;  %v1619_v1 = vsel %vm1587_vm7, 1, %v3235_v32 }
 0x116   : > { %v1497_v20 = vadd.f32 %v1426_v3, %v1277_v38  ;;  %v1334_v3 = vrot.slane %v3059_v5, 2 }
 0x117   : > { %v1799_v48 = vrot.slane %v1798_v42, 2  ;;  %1710 = vperm.xlu2 %2344, %v1619_v1  }
 0x118   : > { %v3063_v40 = vpop.f32.mrf.mxu1  ;;  %v1335_v53 = vsel %vm1308_vm6, %v1332_v18, %v1334_v3  ;;  %v1756_v37 = vsel %vm1724_vm8, %v1497_v20, -1e+30  ;;  %v3247_v18 = vshrl.u32 %v2530_v45, 16  ;;  %vm1943_vm8 = vcmask 1045509  }
 0x119   : > { %v1800_v2 = vmax.f32 %v1798_v42, %v1799_v48  ;;  %v952_v55 = vpop.f32.mrf.mxu2  ;;  %v1208_v10 = vpop.f32.mrf.mxu3  ;;  %v3248_v48 = vshll.u32 %v2530_v45, 16 }
 0x11a   : > { %v1022_v39 = vadd.f32 %v952_v55, %v764_v52  ;;  %v2348_v55 = vld [vmem:[%s2438_s5 + $0x70] sm:$0xff] }
 0x11b   : > { %v1801_v25 = vrot.slane %v1800_v2, 1  ;;  %2194 = vmatmul.msk.bf16.gmra.mxu1 %vm555_vm1, %v2347_v29  ;;  %v1109_v52 = vrot.slane %v3248_v48, 2  ;;  %v860_v9 = vrot.slane %v2348_v55, 1 }
 0x11c   : > { %v1278_v34 = vadd.f32 %v1208_v10, %v1022_v39  ;;  %v3076_v13 = vpop.f32.mrf.mxu0 }
 0x11d   : > { %v1802_v17 = vmax.f32 %v1800_v2, %v1801_v25 }
 0x11e   : > { %v1498_v26 = vadd.f32 %v1428_v41, %v1278_v34  ;;  %2222 = vmatmul.msk.bf16.gmra.mxu2 %vm555_vm1, %v859_v59  ;;  %2250 = vmatmul.msk.bf16.gmra.mxu3 %vm555_vm1, %v1107_v63  ;;  %v1108_v41 = vrot.slane %v3247_v18, 1  ;;  %v1336_v34 = vrot.slane %v2348_v55, 2  ;;  %v861_v63 = vsel %vm832_vm4, %v858_v57, %v860_v9  ;;  %v3112_v18 = vld [vmem:[%s2438_s5 + $0x78] sm:$0xff] }
 0x11f   : > { %v1900_v51 = vadd.f32 %v3036_v22, %v1802_v17  ;;  %2278 = vmatmul.msk.bf16.gmra.mxu0 %vm555_vm1, %v1335_v53 }
 0x120   : > { %v1757_v38 = vsel %vm1725_vm9, %v1498_v26, -1e+30  ;;  %v768_v11 = vpop.f32.mrf.mxu1  ;;  %v1110_v39 = vor.u32 %v1109_v52, %v1108_v41  ;;  %v1337_v26 = vsel %vm1308_vm6, %v1334_v3, %v1336_v34  ;;  %v862_v41 = vrot.slane %v3112_v18, 1 }
 0x121   : > { %v1933_v21 = vrot.slane %v1900_v51, 6  ;;  %v1803_v54 = vmax.f32 %v1756_v37, %v1757_v38  ;;  %v955_v61 = vpop.f32.mrf.mxu2  ;;  %v3085_v46 = vpop.f32.mrf.mxu3  ;;  %vm1946_vm9 = vcmask 1046534  }
 0x122   : > { %v1111_v17 = vsel %vm1052_vm5, %v1106_v4, %v1110_v39 }
 0x123   : > { %v1935_v8 = vsel %vm1934_vm10, %v1933_v21, %v1932_v36  ;;  %v1804_v42 = vrot.slane %v1803_v54, 4 }
 0x124   : > { %v3092_v20 = vpop.f32.mrf.mxu0 }
 0x125   : > { %v1805_v24 = vmax.f32 %v1803_v54, %v1804_v42  ;;  %v3250_v54 = vshll.u32 %v2580_v31, 16 }
 0x127   : > { %v1806_v2 = vrot.slane %v1805_v24, 2  ;;  %v1113_v3 = vrot.slane %v3250_v54, 2 }
 0x128   : > { %v771_v1 = vpop.f32.mrf.mxu1 }
 0x129   : > { %v1807_v10 = vmax.f32 %v1805_v24, %v1806_v2  ;;  %v957_v25 = vpop.f32.mrf.mxu2  ;;  %v1213_v59 = vpop.f32.mrf.mxu3  ;;  %v769_v24 = vadd.f32 %v768_v11, %v2772_v56  ;;  %v772_v56 = vadd.f32 %v771_v1, %v2787_v33 }
 0x12b   : > { %v1808_v36 = vrot.slane %v1807_v10, 1  ;;  %2195 = vmatmul.msk.bf16.gmra.mxu1 %vm555_vm1, %v3059_v5  ;;  %v3249_v5 = vshrl.u32 %v2580_v31, 16  ;;  %v1648_v31 = vpop.permute.xlu2 %1647 }
 0x12c   : > { %v1436_v45 = vpop.f32.mrf.mxu0  ;;  %vm1726_vm13 = vcmp.eq.s32.totalorder %v1648_v31, 1  ;;  %v865_v31 = vsel %vm832_vm4, %v862_v41, %v2632_v60 }
 0x12d   : > { %v1809_v29 = vmax.f32 %v1807_v10, %v1808_v36  ;;  %v1112_v21 = vrot.slane %v3249_v5, 1  ;;  %v863_v36 = vsel %vm832_vm4, %v860_v9, %v862_v41  ;;  %v1119_v5 = vrot.slane %v3235_v32, 2 }
 0x12e   : > { %2223 = vmatmul.msk.bf16.gmra.mxu2 %vm555_vm1, %v861_v63  ;;  %2251 = vmatmul.msk.bf16.gmra.mxu3 %vm555_vm1, %v1111_v17  ;;  %v767_v63 = vadd.f32 %v3063_v40, %v2752_v0  ;;  %v1024_v17 = vadd.f32 %v957_v25, %v769_v24  ;;  %v1651_v40 = vpop.permute.xlu0 %1650  ;;  %v1654_v25 = vpop.permute.xlu1 %1653 }
 0x12f   : > { %v1901_v53 = vadd.f32 %v3036_v22, %v1809_v29  ;;  %2279 = vmatmul.msk.bf16.gmra.mxu0 %vm555_vm1, %v1337_v26  ;;  %v1114_v48 = vor.u32 %v1113_v3, %v1112_v21  ;;  %vm1727_vm12 = vcmp.eq.s32.totalorder %v1651_v40, 1  ;;  %vm1728_vm15 = vcmp.eq.s32.totalorder %v1654_v25, 1 }
 0x130   : > { %v773_v37 = vpop.f32.mrf.mxu1  ;;  %v1280_v0 = vadd.f32 %v1213_v59, %v1024_v17 }
 0x131   : > { %v1936_v51 = vrot.slane %v1901_v53, 5  ;;  %v960_v57 = vpop.f32.mrf.mxu2  ;;  %v1216_v4 = vpop.f32.mrf.mxu3  ;;  %v774_v29 = vadd.f32 %v773_v37, %v2807_v49  ;;  %v1115_v26 = vsel %vm1052_vm5, %v1110_v39, %v1114_v48  ;;  %v1023_v53 = vadd.f32 %v955_v61, %v767_v63 }
 0x132   : > { %v1025_v49 = vadd.f32 %v960_v57, %v772_v56 }
 0x133   : > { %v3105_v38 = vsel %vm1937_vm11, %v1936_v51, %v1935_v8  ;;  %v1338_v8 = vrot.slane %v3112_v18, 2  ;;  %v1279_v61 = vadd.f32 %v3085_v46, %v1023_v53  ;;  %v1657_v54 = vpop.permute.xlu2 %1656  ;;  %v1120_v46 = vor.u32 %v1119_v5, %v2632_v60 }
 0x134   : > { %v1438_v42 = vpop.f32.mrf.mxu0  ;;  %v1281_v21 = vadd.f32 %v1216_v4, %v1025_v49  ;;  %vm1729_vm14 = vcmp.eq.s32.totalorder %v1657_v54, 1 }
 0x135   : > { %v1339_v9 = vsel %vm1308_vm6, %v1336_v34, %v1338_v8  ;;  %v1500_v34 = vadd.f32 %v3092_v20, %v1280_v0  ;;  %v1499_v57 = vadd.f32 %v3076_v13, %v1279_v61  ;;  %v1341_v0 = vsel %vm1308_vm6, %v1338_v8, %v1119_v5 }
 0x136   : > { %v1660_v32 = vpop.permute.xlu0 %1659  ;;  %v1663_v4 = vpop.permute.xlu1 %1662 }
 0x137   : > { %v1759_v24 = vsel %vm1727_vm12, %v1500_v34, -1e+30  ;;  %vm1730_vm0 = vcmp.eq.s32.totalorder %v1660_v32, 1  ;;  %vm1731_vm3 = vcmp.eq.s32.totalorder %v1663_v4, 1  ;;  %vm1949_vm12 = vcmask 1047559  }
 0x138   : > { %v776_v10 = vpop.f32.mrf.mxu1 }
 0x139   : > { %v962_v52 = vpop.f32.mrf.mxu2  ;;  %v1218_v2 = vpop.f32.mrf.mxu3  ;;  %v777_v39 = vadd.f32 %v776_v10, %v2822_v50  ;;  %v1501_v50 = vadd.f32 %v1436_v45, %v1281_v21  ;;  %v1121_v45 = vsel %vm1052_vm5, %v1114_v48, %v1120_v46  ;;  %vm1940_vm5 = vcmask 1044484  }
 0x13a   : > { %v1026_v11 = vadd.f32 %v962_v52, %v774_v29 }
 0x13b   : > { %2196 = vmatmul.msk.bf16.gmra.mxu1 %vm555_vm1, %v2348_v55  ;;  %v1666_v54 = vpop.permute.xlu2 %1665 }
 0x13c   : > { %v1441_v51 = vpop.f32.mrf.mxu0  ;;  %v1282_v33 = vadd.f32 %v1218_v2, %v1026_v11 }
 0x13e   : > { %2224 = vmatmul.msk.bf16.gmra.mxu2 %vm555_vm1, %v863_v36  ;;  %2252 = vmatmul.msk.bf16.gmra.mxu3 %vm555_vm1, %v1115_v26  ;;  %v1502_v3 = vadd.f32 %v1438_v42, %v1282_v33  ;;  %v1758_v36 = vsel %vm1726_vm13, %v1499_v57, -1e+30  ;;  %v1760_v26 = vsel %vm1728_vm15, %v1501_v50, -1e+30 }
 0x13f   : > { %2280 = vmatmul.msk.bf16.gmra.mxu0 %vm555_vm1, %v1339_v9  ;;  %v1810_v42 = vmax.f32 %v1758_v36, %v1759_v24 }
 0x140   : > { %v778_v37 = vpop.f32.mrf.mxu1  ;;  %v1761_v63 = vsel %vm1729_vm14, %v1502_v3, -1e+30  ;;  %v1669_v3 = vpop.permute.xlu0 %1668 }
 0x141   : > { %v965_v55 = vpop.f32.mrf.mxu2  ;;  %v1221_v1 = vpop.f32.mrf.mxu3  ;;  %v779_v10 = vadd.f32 %v778_v37, %v2841_v7  ;;  %v1817_v11 = vmax.f32 %v1760_v26, %v1761_v63  ;;  %v1811_v60 = vrot.slane %v1810_v42, 4  ;;  %vm1733_vm4 = vcmp.eq.s32.totalorder %v1669_v3, 1 }
 0x142   : > { %v1027_v59 = vadd.f32 %v965_v55, %v777_v39 }
 0x143   : > { %v1818_v48 = vrot.slane %v1817_v11, 4  ;;  %v1812_v33 = vmax.f32 %v1810_v42, %v1811_v60 }
 0x144   : > { %v1443_v52 = vpop.f32.mrf.mxu0  ;;  %v1283_v2 = vadd.f32 %v1221_v1, %v1027_v59 }
 0x145   : > { %v1813_v5 = vrot.slane %v1812_v33, 2 }
 0x146   : > { %v1503_v53 = vadd.f32 %v1441_v51, %v1283_v2 }
 0x147   : > { %v1814_v50 = vmax.f32 %v1812_v33, %v1813_v5 }
 0x148   : > { %v781_v13 = vpop.f32.mrf.mxu1  ;;  %v1762_v41 = vsel %vm1730_vm0, %v1503_v53, -1e+30 }
 0x149   : > { %v967_v20 = vpop.f32.mrf.mxu2  ;;  %v1223_v29 = vpop.f32.mrf.mxu3  ;;  %v782_v25 = vadd.f32 %v781_v13, %v2857_v12  ;;  %v1815_v63 = vrot.slane %v1814_v50, 1 }
 0x14a   : > { %v1028_v17 = vadd.f32 %v967_v20, %v779_v10 }
 0x14b   : > { %2197 = vmatmul.msk.bf16.gmra.mxu1 %vm555_vm1, %v3112_v18  ;;  %v1819_v18 = vmax.f32 %v1817_v11, %v1818_v48  ;;  %v1816_v11 = vmax.f32 %v1814_v50, %v1815_v63 }
 0x14c   : > { %v1284_v56 = vadd.f32 %v1223_v29, %v1028_v17  ;;  %v1446_v9 = vpop.f32.mrf.mxu0 }
 0x14d   : > { %v1820_v59 = vrot.slane %v1819_v18, 2 }
 0x14e   : > { %v1504_v7 = vadd.f32 %v1443_v52, %v1284_v56  ;;  %2225 = vmatmul.msk.bf16.gmra.mxu2 %vm555_vm1, %v865_v31  ;;  %2253 = vmatmul.msk.bf16.gmra.mxu3 %vm555_vm1, %v1121_v45 }
 0x14f   : > { %2281 = vmatmul.msk.bf16.gmra.mxu0 %vm555_vm1, %v1341_v0  ;;  %v1821_v32 = vmax.f32 %v1819_v18, %v1820_v59  ;;  %vm1732_vm1 = vcmp.eq.s32.totalorder %v1666_v54, 1 }
 0x150   : > { %v1763_v51 = vsel %vm1731_vm3, %v1504_v7, -1e+30  ;;  %v783_v61 = vpop.f32.mrf.mxu1 }
 0x151   : > { %v1824_v40 = vmax.f32 %v1762_v41, %v1763_v51  ;;  %v970_v49 = vpop.f32.mrf.mxu2  ;;  %v1226_v55 = vpop.f32.mrf.mxu3  ;;  %v784_v21 = vadd.f32 %v783_v61, %v2880_v27  ;;  %v1822_v13 = vrot.slane %v1821_v32, 1 }
 0x152   : > { %v1029_v1 = vadd.f32 %v970_v49, %v782_v25  ;;  %v1672_v25 = vpop.permute.xlu1 %1671 }
 0x153   : > { %v1825_v39 = vrot.slane %v1824_v40, 4  ;;  %v1823_v0 = vmax.f32 %v1821_v32, %v1822_v13  ;;  %vm1734_vm6 = vcmp.eq.s32.totalorder %v1672_v25, 1 }
 0x154   : > { %v1448_v8 = vpop.f32.mrf.mxu0  ;;  %v1285_v34 = vadd.f32 %v1226_v55, %v1029_v1 }
 0x155   : > { %v1826_v37 = vmax.f32 %v1824_v40, %v1825_v39  ;;  %v1902_v40 = vadd.f32 %v3036_v22, %v1816_v11  ;;  %v1903_v55 = vadd.f32 %v3036_v22, %v1823_v0  ;;  %v1675_v39 = vpop.permute.xlu2 %1674 }
 0x156   : > { %v1505_v2 = vadd.f32 %v1446_v9, %v1285_v34  ;;  %vm1735_vm7 = vcmp.eq.s32.totalorder %v1675_v39, 1 }
 0x157   : > { %v1827_v52 = vrot.slane %v1826_v37, 2  ;;  %v1939_v5 = vrot.slane %v1902_v40, 4  ;;  %v1942_v54 = vrot.slane %v1903_v55, 3 }
 0x158   : > { %v786_v12 = vpop.f32.mrf.mxu1  ;;  %v1764_v17 = vsel %vm1732_vm1, %v1505_v2, -1e+30 }
 0x159   : > { %v972_v57 = vpop.f32.mrf.mxu2  ;;  %v1228_v24 = vpop.f32.mrf.mxu3  ;;  %v1828_v20 = vmax.f32 %v1826_v37, %v1827_v52  ;;  %v787_v27 = vadd.f32 %v786_v12, %v2768_v47  ;;  %v1941_v52 = vsel %vm1940_vm5, %v1939_v5, %v3105_v38 }
 0x15a   : > { %v1030_v46 = vadd.f32 %v972_v57, %v784_v21  ;;  %v1944_v2 = vsel %vm1943_vm8, %v1942_v54, %v1941_v52  ;;  %v1681_v11 = vpop.permute.xlu1 %1680 }
 0x15b   : > { %v1829_v26 = vrot.slane %v1828_v20, 1  ;;  %vm1737_vm14 = vcmp.eq.s32.totalorder %v1681_v11, 1 }
 0x15c   : > { %v1286_v10 = vadd.f32 %v1228_v24, %v1030_v46  ;;  %v1451_v36 = vpop.f32.mrf.mxu0 }
 0x15d   : > { %v1830_v41 = vmax.f32 %v1828_v20, %v1829_v26  ;;  %v1684_v52 = vpop.permute.xlu2 %1683 }
 0x15e   : > { %v1506_v4 = vadd.f32 %v1448_v8, %v1286_v10  ;;  %vm1738_vm0 = vcmp.eq.s32.totalorder %v1684_v52, 1 }
 0x15f   : > { %v1904_v1 = vadd.f32 %v3036_v22, %v1830_v41 }
 0x160   : > { %v1765_v29 = vsel %vm1733_vm4, %v1506_v4, -1e+30  ;;  %v788_v45 = vpop.f32.mrf.mxu1 }
 0x161   : > { %v1831_v42 = vmax.f32 %v1764_v17, %v1765_v29  ;;  %v975_v31 = vpop.f32.mrf.mxu2  ;;  %v1231_v56 = vpop.f32.mrf.mxu3  ;;  %v789_v47 = vadd.f32 %v788_v45, %v2783_v6  ;;  %v1945_v6 = vrot.slane %v1904_v1, 2 }
 0x162   : > { %v1031_v53 = vadd.f32 %v975_v31, %v787_v27  ;;  %v1678_v45 = vpop.permute.xlu0 %1677 }
 0x163   : > { %v1832_v7 = vrot.slane %v1831_v42, 4  ;;  %v1947_v20 = vsel %vm1946_vm9, %v1945_v6, %v1944_v2  ;;  %vm1736_vm13 = vcmp.eq.s32.totalorder %v1678_v45, 1 }
 0x164   : > { %v1287_v9 = vadd.f32 %v1231_v56, %v1031_v53  ;;  %v1453_v48 = vpop.f32.mrf.mxu0 }
 0x165   : > { %v1833_v60 = vmax.f32 %v1831_v42, %v1832_v7 }
 0x166   : > { %v1507_v51 = vadd.f32 %v1451_v36, %v1287_v9 }
 0x167   : > { %v1834_v49 = vrot.slane %v1833_v60, 2 }
 0x168   : > { %v791_v8 = vpop.f32.mrf.mxu1  ;;  %v1766_v24 = vsel %vm1734_vm6, %v1507_v51, -1e+30 }
 0x169   : > { %v1835_v61 = vmax.f32 %v1833_v60, %v1834_v49  ;;  %v977_v33 = vpop.f32.mrf.mxu2  ;;  %v1233_v37 = vpop.f32.mrf.mxu3  ;;  %v792_v12 = vadd.f32 %v791_v8, %v2803_v35 }
 0x16a   : > { %v1032_v18 = vadd.f32 %v977_v33, %v789_v47 }
 0x16b   : > { %v1836_v34 = vrot.slane %v1835_v61, 1 }
 0x16c   : > { %v1288_v21 = vadd.f32 %v1233_v37, %v1032_v18  ;;  %v1456_v3 = vpop.f32.mrf.mxu0 }
 0x16d   : > { %v1837_v59 = vmax.f32 %v1835_v61, %v1836_v34 }
 0x16e   : > { %v1508_v57 = vadd.f32 %v1453_v48, %v1288_v21 }
 0x16f   : > { %v1905_v46 = vadd.f32 %v3036_v22, %v1837_v59 }
 0x170   : > { %v1767_v50 = vsel %vm1735_vm7, %v1508_v57, -1e+30  ;;  %v793_v63 = vpop.f32.mrf.mxu1 }
 0x171   : > { %v1948_v10 = vrot.slane %v1905_v46, 1  ;;  %v1838_v32 = vmax.f32 %v1766_v24, %v1767_v50  ;;  %v980_v38 = vpop.f32.mrf.mxu2  ;;  %v1236_v36 = vpop.f32.mrf.mxu3  ;;  %v794_v13 = vadd.f32 %v793_v63, %v2818_v62 }
 0x172   : > { %v1033_v4 = vadd.f32 %v980_v38, %v792_v12 }
 0x173   : > { %v1950_v35 = vsel %vm1949_vm12, %v1948_v10, %v1947_v20  ;;  %v1839_v42 = vrot.slane %v1838_v32, 4 }
 0x174   : > { %1967 = vst [vmem:[%s3165_s15] sm:$0xff] %v1950_v35  ;;  %v1289_v17 = vadd.f32 %v1236_v36, %v1033_v4  ;;  %v1458_v29 = vpop.f32.mrf.mxu0 }
 0x175   : > { %v1840_v9 = vmax.f32 %v1838_v32, %v1839_v42 }
 0x176   : > { %v1509_v27 = vadd.f32 %v1456_v3, %v1289_v17  ;;  %v1687_v3 = vpop.permute.xlu0 %1686 }
 0x177   : > { %v1841_v40 = vrot.slane %v1840_v9, 2  ;;  %vm1739_vm15 = vcmp.eq.s32.totalorder %v1687_v3, 1 }
 0x178   : > { %v796_v56 = vpop.f32.mrf.mxu1  ;;  %v1768_v41 = vsel %vm1736_vm13, %v1509_v27, -1e+30 }
 0x179   : > { %v982_v31 = vpop.f32.mrf.mxu2  ;;  %v1238_v53 = vpop.f32.mrf.mxu3  ;;  %v797_v48 = vadd.f32 %v796_v56, %v2837_v30  ;;  %v1842_v39 = vmax.f32 %v1840_v9, %v1841_v40 }
 0x17a   : > { %v1034_v26 = vadd.f32 %v982_v31, %v794_v13  ;;  %v1693_v40 = vpop.permute.xlu2 %1692 }
 0x17b   : > { %v1843_v34 = vrot.slane %v1842_v39, 1  ;;  %vm1741_vm3 = vcmp.eq.s32.totalorder %v1693_v40, 1 }
 0x17c   : > { %v1290_v7 = vadd.f32 %v1238_v53, %v1034_v26  ;;  %v1461_v60 = vpop.f32.mrf.mxu0 }
 0x17d   : > { %v1844_v24 = vmax.f32 %v1842_v39, %v1843_v34 }
 0x17e   : > { %v1510_v0 = vadd.f32 %v1458_v29, %v1290_v7 }
 0x17f   : > { %v1906_v20 = vadd.f32 %v3036_v22, %v1844_v24 }
 0x180   : > { %v1769_v51 = vsel %vm1737_vm14, %v1510_v0, -1e+30  ;;  %v798_v55 = vpop.f32.mrf.mxu1 }
 0x181   : > { %v1845_v49 = vmax.f32 %v1768_v41, %v1769_v51  ;;  %v985_v62 = vpop.f32.mrf.mxu2  ;;  %v1241_v25 = vpop.f32.mrf.mxu3  ;;  %v799_v5 = vadd.f32 %v798_v55, %v2853_v44 }
 0x182   : > { %v1035_v47 = vadd.f32 %v985_v62, %v797_v48  ;;  %v1690_v51 = vpop.permute.xlu1 %1689 }
 0x183   : > { %v1846_v61 = vrot.slane %v1845_v49, 4 }
 0x184   : > { %v1291_v33 = vadd.f32 %v1241_v25, %v1035_v47  ;;  %v1463_v37 = vpop.f32.mrf.mxu0 }
 0x185   : > { %v1847_v1 = vmax.f32 %v1845_v49, %v1846_v61 }
 0x186   : > { %v1511_v18 = vadd.f32 %v1461_v60, %v1291_v33 }
 0x187   : > { %v1848_v8 = vrot.slane %v1847_v1, 2 }
 0x188   : > { %v801_v6 = vpop.f32.mrf.mxu1  ;;  %v1770_v32 = vsel %vm1738_vm0, %v1511_v18, -1e+30 }
 0x189   : > { %v1849_v21 = vmax.f32 %v1847_v1, %v1848_v8  ;;  %v987_v54 = vpop.f32.mrf.mxu2  ;;  %v1243_v30 = vpop.f32.mrf.mxu3  ;;  %v802_v38 = vadd.f32 %v801_v6, %v2875_v16 }
 0x18a   : > { %v1036_v59 = vadd.f32 %v987_v54, %v799_v5 }
 0x18b   : > { %v1850_v57 = vrot.slane %v1849_v21, 1 }
 0x18c   : > { %v1292_v46 = vadd.f32 %v1243_v30, %v1036_v59  ;;  %v1466_v2 = vpop.f32.mrf.mxu0 }
 0x18d   : > { %v1851_v12 = vmax.f32 %v1849_v21, %v1850_v57 }
 0x18e   : > { %v1512_v50 = vadd.f32 %v1463_v37, %v1292_v46 }
 0x18f   : > { %v1907_v10 = vadd.f32 %v3036_v22, %v1851_v12 }
 0x190   : > { %v1771_v44 = vsel %vm1739_vm15, %v1512_v50, -1e+30  ;;  %v803_v27 = vpop.f32.mrf.mxu1 }
 0x191   : > { %v1951_v4 = vrot.slane %v1907_v10, 7  ;;  %v1852_v36 = vmax.f32 %v1770_v32, %v1771_v44  ;;  %v990_v63 = vpop.f32.mrf.mxu2  ;;  %v1246_v17 = vpop.f32.mrf.mxu3  ;;  %v804_v45 = vadd.f32 %v803_v27, %v2894_v19 }
 0x192   : > { %v1037_v35 = vadd.f32 %v990_v63, %v802_v38 }
 0x193   : > { %v1952_v29 = vsel %vm1931_vm2, %v1951_v4, %v1906_v20  ;;  %v1853_v13 = vrot.slane %v1852_v36, 4  ;;  %vm1740_vm2 = vcmp.eq.s32.totalorder %v1690_v51, 1 }
 0x194   : > { %v1293_v42 = vadd.f32 %v1246_v17, %v1037_v35  ;;  %v1468_v53 = vpop.f32.mrf.mxu0  ;;  %v1696_v35 = vpop.permute.xlu0 %1695 }
 0x195   : > { %v1854_v31 = vmax.f32 %v1852_v36, %v1853_v13  ;;  %vm1742_vm1 = vcmp.eq.s32.totalorder %v1696_v35, 1 }
 0x196   : > { %v1513_v26 = vadd.f32 %v1466_v2, %v1293_v42 }
 0x197   : > { %v1855_v56 = vrot.slane %v1854_v31, 2 }
 0x198   : > { %v806_v0 = vpop.f32.mrf.mxu1  ;;  %v1772_v25 = vsel %vm1740_vm2, %v1513_v26, -1e+30 }
 0x199   : > { %v1856_v11 = vmax.f32 %v1854_v31, %v1855_v56  ;;  %v992_v16 = vpop.f32.mrf.mxu2  ;;  %v1248_v9 = vpop.f32.mrf.mxu3  ;;  %v807_v36 = vadd.f32 %v806_v0, %v2770_v14 }
 0x19a   : > { %v1038_v7 = vadd.f32 %v992_v16, %v804_v45  ;;  %v1702_v31 = vpop.permute.xlu2 %1701 }
 0x19b   : > { %v1857_v60 = vrot.slane %v1856_v11, 1  ;;  %vm1744_vm4 = vcmp.eq.s32.totalorder %v1702_v31, 1 }
 0x19c   : > { %v1294_v41 = vadd.f32 %v1248_v9, %v1038_v7  ;;  %v1471_v62 = vpop.f32.mrf.mxu0 }
 0x19d   : > { %v1858_v48 = vmax.f32 %v1856_v11, %v1857_v60 }
 0x19e   : > { %v1514_v49 = vadd.f32 %v1468_v53, %v1294_v41 }
 0x19f   : > { %v1908_v47 = vadd.f32 %v3036_v22, %v1858_v48 }
 0x1a0   : > { %v1773_v55 = vsel %vm1741_vm3, %v1514_v49, -1e+30  ;;  %v808_v1 = vpop.f32.mrf.mxu1 }
 0x1a1   : > { %v1953_v61 = vrot.slane %v1908_v47, 6  ;;  %v1859_v19 = vmax.f32 %v1772_v25, %v1773_v55  ;;  %v995_v33 = vpop.f32.mrf.mxu2  ;;  %v1251_v39 = vpop.f32.mrf.mxu3  ;;  %v809_v20 = vadd.f32 %v808_v1, %v2785_v23 }
 0x1a3   : > { %v1954_v18 = vsel %vm1934_vm10, %v1953_v61, %v1952_v29  ;;  %v1860_v37 = vrot.slane %v1859_v19, 4  ;;  %v1039_v29 = vadd.f32 %v995_v33, %v807_v36  ;;  %v1711_v33 = vpop.permute.xlu2 %1710 }
 0x1a4   : > { %v1473_v5 = vpop.f32.mrf.mxu0  ;;  %vm1747_vm7 = vcmp.eq.s32.totalorder %v1711_v33, 1 }
 0x1a5   : > { %v1861_v8 = vmax.f32 %v1859_v19, %v1860_v37  ;;  %v1295_v16 = vadd.f32 %v1251_v39, %v1039_v29 }
 0x1a7   : > { %v1862_v34 = vrot.slane %v1861_v8, 2  ;;  %v1515_v60 = vadd.f32 %v1471_v62, %v1295_v16 }
 0x1a8   : > { %v811_v30 = vpop.f32.mrf.mxu1 }
 0x1a9   : > { %v1863_v21 = vmax.f32 %v1861_v8, %v1862_v34  ;;  %v997_v54 = vpop.f32.mrf.mxu2  ;;  %v1253_v59 = vpop.f32.mrf.mxu3  ;;  %v812_v17 = vadd.f32 %v811_v30, %v2805_v28  ;;  %v1774_v61 = vsel %vm1742_vm1, %v1515_v60, -1e+30 }
 0x1aa   : > { %v1040_v63 = vadd.f32 %v997_v54, %v809_v20  ;;  %v1705_v28 = vpop.permute.xlu0 %1704  ;;  %v3252_v20 = vld [vmem:[#allocation3_spill] sm:$0xff] }
 0x1ab   : > { %v1864_v6 = vrot.slane %v1863_v21, 1 }
 0x1ac   : > { %v1476_v3 = vpop.f32.mrf.mxu0  ;;  %v1296_v26 = vadd.f32 %v1253_v59, %v1040_v63 }
 0x1ad   : > { %v1865_v57 = vmax.f32 %v1863_v21, %v1864_v6  ;;  %v3251_v6 = vld [vmem:[#allocation2_spill] sm:$0xff] }
 0x1ae   : > { %v1516_v9 = vadd.f32 %v1473_v5, %v1296_v26 }
 0x1af   : > { %v1909_v52 = vadd.f32 %v3036_v22, %v1865_v57 }
 0x1b0   : > { %v813_v50 = vpop.f32.mrf.mxu1 }
 0x1b1   : > { %v1955_v46 = vrot.slane %v1909_v52, 5  ;;  %v1000_v24 = vpop.f32.mrf.mxu2  ;;  %v1256_v12 = vpop.f32.mrf.mxu3  ;;  %v814_v4 = vadd.f32 %v813_v50, %v2820_v43 }
 0x1b2   : > { %v1041_v42 = vadd.f32 %v1000_v24, %v812_v17  ;;  %v1699_v43 = vpop.permute.xlu1 %1698  ;;  %v1714_v29 = vpop.permute.xlu0 %1713 }
 0x1b3   : > { %v3182_v2 = vsel %vm1937_vm11, %v1955_v46, %v1954_v18  ;;  %vm1743_vm10 = vcmp.eq.s32.totalorder %v1699_v43, 1  ;;  %vm1745_vm11 = vcmp.eq.s32.totalorder %v1705_v28, 1  ;;  %vm1748_vm13 = vcmp.eq.s32.totalorder %v1714_v29, 1 }
 0x1b4   : > { %v1478_v10 = vpop.f32.mrf.mxu0  ;;  %v1297_v7 = vadd.f32 %v1256_v12, %v1041_v42  ;;  %v1775_v40 = vsel %vm1743_vm10, %v1516_v9, -1e+30 }
 0x1b5   : > { %v1866_v39 = vmax.f32 %v1774_v61, %v1775_v40 }
 0x1b6   : > { %v1517_v41 = vadd.f32 %v1476_v3, %v1297_v7 }
 0x1b8   : > { %v816_v38 = vpop.f32.mrf.mxu1  ;;  %v1776_v62 = vsel %vm1744_vm4, %v1517_v41, -1e+30 }
 0x1b9   : > { %v1002_v32 = vpop.f32.mrf.mxu2  ;;  %v1258_v44 = vpop.f32.mrf.mxu3  ;;  %v817_v45 = vadd.f32 %v816_v38, %v2839_v58 }
 0x1ba   : > { %v1042_v27 = vadd.f32 %v1002_v32, %v814_v4  ;;  %v1708_v8 = vpop.permute.xlu1 %1707 }
 0x1bb   : > { %vm1746_vm6 = vcmp.eq.s32.totalorder %v1708_v8, 1 }
 0x1bc   : > { %v1481_v13 = vpop.f32.mrf.mxu0  ;;  %v1298_v56 = vadd.f32 %v1258_v44, %v1042_v27 }
 0x1be   : > { %v1518_v0 = vadd.f32 %v1478_v10, %v1298_v56 }
 0x1c0   : > { %v818_v23 = vpop.f32.mrf.mxu1  ;;  %v1777_v58 = vsel %vm1745_vm11, %v1518_v0, -1e+30 }
 0x1c1   : > { %v1005_v53 = vpop.f32.mrf.mxu2  ;;  %v1261_v11 = vpop.f32.mrf.mxu3  ;;  %v819_v48 = vadd.f32 %v818_v23, %v2855_v15  ;;  %v1873_v37 = vmax.f32 %v1776_v62, %v1777_v58  ;;  %v1867_v15 = vrot.slane %v1866_v39, 4 }
 0x1c2   : > { %v1043_v14 = vadd.f32 %v1005_v53, %v817_v45 }
 0x1c3   : > { %v1874_v54 = vrot.slane %v1873_v37, 4  ;;  %v1868_v24 = vmax.f32 %v1866_v39, %v1867_v15 }
 0x1c4   : > { %v1299_v51 = vadd.f32 %v1261_v11, %v1043_v14  ;;  %v1483_v49 = vpop.f32.mrf.mxu0 }
 0x1c5   : > { %v1875_v50 = vmax.f32 %v1873_v37, %v1874_v54  ;;  %v1869_v44 = vrot.slane %v1868_v24, 2 }
 0x1c6   : > { %v1519_v1 = vadd.f32 %v1481_v13, %v1299_v51  ;;  %v1717_v13 = vpop.permute.xlu1 %1716 }
 0x1c7   : > { %v1876_v36 = vrot.slane %v1875_v50, 2  ;;  %v1870_v42 = vmax.f32 %v1868_v24, %v1869_v44  ;;  %vm1749_vm14 = vcmp.eq.s32.totalorder %v1717_v13, 1 }
 0x1c8   : > { %v821_v19 = vpop.f32.mrf.mxu1  ;;  %v1778_v34 = vsel %vm1746_vm6, %v1519_v1, -1e+30 }
 0x1c9   : > { %v1007_v47 = vpop.f32.mrf.mxu2  ;;  %v1263_v55 = vpop.f32.mrf.mxu3  ;;  %v822_v57 = vadd.f32 %v821_v19, %v3251_v6  ;;  %v1877_v53 = vmax.f32 %v1875_v50, %v1876_v36  ;;  %v1871_v23 = vrot.slane %v1870_v42, 1 }
 0x1ca   : > { %v1044_v25 = vadd.f32 %v1007_v47, %v819_v48 }
 0x1cb   : > { %v1878_v7 = vrot.slane %v1877_v53, 1  ;;  %v1872_v60 = vmax.f32 %v1870_v42, %v1871_v23 }
 0x1cc   : > { %v1300_v18 = vadd.f32 %v1263_v55, %v1044_v25  ;;  %v1486_v46 = vpop.f32.mrf.mxu0 }
 0x1cd   : > { %v1879_v28 = vmax.f32 %v1877_v53, %v1878_v7  ;;  %v1910_v40 = vadd.f32 %v3036_v22, %v1872_v60 }
 0x1ce   : > { %v1520_v5 = vadd.f32 %v1483_v49, %v1300_v18 }
 0x1cf   : > { %v1911_v49 = vadd.f32 %v3036_v22, %v1879_v28  ;;  %v1957_v55 = vrot.slane %v1910_v40, 4 }
 0x1d0   : > { %v1779_v21 = vsel %vm1747_vm7, %v1520_v5, -1e+30  ;;  %v823_v10 = vpop.f32.mrf.mxu1 }
 0x1d1   : > { %v1880_v59 = vmax.f32 %v1778_v34, %v1779_v21  ;;  %v1010_v30 = vpop.f32.mrf.mxu2  ;;  %v1266_v3 = vpop.f32.mrf.mxu3  ;;  %v824_v4 = vadd.f32 %v823_v10, %v3252_v20  ;;  %v1959_v61 = vrot.slane %v1911_v49, 3  ;;  %v1958_v62 = vsel %vm1940_vm5, %v1957_v55, %v3182_v2 }
 0x1d2   : > { %v1045_v12 = vadd.f32 %v1010_v30, %v822_v57 }
 0x1d3   : > { %v1881_v52 = vrot.slane %v1880_v59, 4  ;;  %v1960_v1 = vsel %vm1943_vm8, %v1959_v61, %v1958_v62 }
 0x1d4   : > { %v1301_v38 = vadd.f32 %v1266_v3, %v1045_v12  ;;  %v1488_v56 = vpop.f32.mrf.mxu0 }
 0x1d5   : > { %v1882_v32 = vmax.f32 %v1880_v59, %v1881_v52 }
 0x1d6   : > { %v1521_v31 = vadd.f32 %v1486_v46, %v1301_v38 }
 0x1d7   : > { %v1883_v35 = vrot.slane %v1882_v32, 2 }
 0x1d8   : > { %v1780_v16 = vsel %vm1748_vm13, %v1521_v31, -1e+30 }
 0x1d9   : > { %v1012_v63 = vpop.f32.mrf.mxu2  ;;  %v1268_v27 = vpop.f32.mrf.mxu3  ;;  %v1884_v45 = vmax.f32 %v1882_v32, %v1883_v35 }
 0x1da   : > { %v1046_v17 = vadd.f32 %v1012_v63, %v824_v4 }
 0x1db   : > { %v1885_v9 = vrot.slane %v1884_v45, 1 }
 0x1dc   : > { %v1302_v26 = vadd.f32 %v1268_v27, %v1046_v17 }
 0x1dd   : > { %v1886_v51 = vmax.f32 %v1884_v45, %v1885_v9 }
 0x1de   : > { %v1522_v11 = vadd.f32 %v1488_v56, %v1302_v26 }
 0x1df   : > { %v1912_v58 = vadd.f32 %v3036_v22, %v1886_v51 }
 0x1e0   : > { %v1781_v43 = vsel %vm1749_vm14, %v1522_v11, -1e+30 }
 0x1e1   : > { %v1887_v14 = vmax.f32 %v1780_v16, %v1781_v43  ;;  %v1961_v33 = vrot.slane %v1912_v58, 2 }
 0x1e3   : > { %v1888_v0 = vrot.slane %v1887_v14, 4  ;;  %v1962_v37 = vsel %vm1946_vm9, %v1961_v33, %v1960_v1 }
 0x1e5   : > { %v1889_v41 = vmax.f32 %v1887_v14, %v1888_v0 }
 0x1e7   : > { %v1890_v48 = vrot.slane %v1889_v41, 2 }
 0x1e9   : > { %v1891_v47 = vmax.f32 %v1889_v41, %v1890_v48 }
 0x1eb   : > { %v1892_v25 = vrot.slane %v1891_v47, 1 }
 0x1ed   : > { %v1893_v19 = vmax.f32 %v1891_v47, %v1892_v25 }
 0x1ef   : > { %v1913_v39 = vadd.f32 %v3036_v22, %v1893_v19 }
 0x1f1   : > { %v1963_v18 = vrot.slane %v1913_v39, 1 }
 0x1f3   : > { %v1964_v8 = vsel %vm1949_vm12, %v1963_v18, %v1962_v37 }
 0x1f4   : > { %1968 = vst [vmem:[%s3165_s15 + $0x8] sm:$0xff] %v1964_v8 }
 0x1f5 PF: > { %s14_s17 = sadd.s32 1, %s2372_s17   ;;  %s3253_s15 = smov %s2368_s16 }
 0x1f6   : > { %p11_p7 = scmp.ge.s32.totalorder %s14_s17, 5   ;;  %s3254_s16 = smov %s3256_s18 }
 0x1f8   :  { %13 = sbr.rel (!%p11_p7) target bundleno = 2 (0x2), region = 79 }

</bundles_post_ra>
